<compile_context>
chip_gen: v5e
topology: v5e:2x2
jax: 0.10.0
libtpu: 0.0.40
codegen_flags: <defaults>
</compile_context>

<pallas_src>
import functools
import math

import jax
import jax.numpy as jnp
from jax import lax
from jax.experimental import pallas as pl
from jax.experimental.pallas import tpu as pltpu


# -----------------------------------------------------------------------------
# Fused layer kernel: grid = (batch, query_tile)
# -----------------------------------------------------------------------------
def _fused_layer_kernel(
        neg_gamma_ref,                       # SMEM (H,) f32: -softplus(gammas)
        query_ref,                           # (1, Tq, D) f32  (q-proj input + residual)
        key_ref, values_ref,                 # (1, S, D) f32   (full sequence)
        qw_ref, qb_ref,                      # (D, D), (1, D)  q projection
        kw_ref, kb_ref,                      # (D, D), (1, D)  k projection
        vw_ref, vb_ref,                      # (D, D), (1, D)  v projection
        lt_ref,                              # (S, S) strictly-lower-tri ones
        wo_ref, bo_ref,                      # (D, D), (1, D)  out_proj
        ln1_w_ref, ln1_b_ref,                # (1, D)
        w1_ref, b1_ref,                      # (D, d_ff), (1, d_ff)
        w2_ref, b2_ref,                      # (d_ff, D), (1, D)
        ln2_w_ref, ln2_b_ref,                # (1, D)
        o_ref,                               # (1, Tq, D) output tile
        k_scr, v_scr,                        # (S, D) scratch: cached k/v projections
        concat_scr,                          # (Tq, D) scratch: per-head outputs
        *, n_heads, d_k, mask_int, zero_pad, apply_pos, compute_dtype,
        approx_recip):
    f32 = jnp.float32
    Tq = query_ref.shape[1]
    S = key_ref.shape[1]
    neg_inf = f32(-1e32)
    eps = f32(1e-5)
    qt = pl.program_id(1)

    # ---- k / v projections of the full sequence: once per batch element -----
    @pl.when(qt == 0)
    def _():
        k_scr[...] = (jnp.dot(key_ref[0], kw_ref[...],
                              preferred_element_type=f32)
                      + kb_ref[...]).astype(k_scr.dtype)
        v_scr[...] = (jnp.dot(values_ref[0], vw_ref[...],
                              preferred_element_type=f32)
                      + vb_ref[...]).astype(v_scr.dtype)

    # ---- q projection for this query tile (1/sqrt(d_k) folded in once) ------
    x_tile = query_ref[0]                                        # (Tq, D) f32
    q_proj = (jnp.dot(x_tile, qw_ref[...], preferred_element_type=f32)
              + qb_ref[...]) * f32(1.0 / math.sqrt(d_k))

    # ---- per-tile mask / distance geometry (cheap iota, global row index) ----
    row = lax.broadcasted_iota(jnp.int32, (Tq, S), 0) + qt * Tq   # global i
    col = lax.broadcasted_iota(jnp.int32, (Tq, S), 1)             # j
    allowed = (col - row) < mask_int                              # src_mask == 1
    mask_f = allowed.astype(f32)
    pos_eff = jnp.abs(col - row).astype(f32)
    row0 = row[:, :1] == 0                                        # (Tq, 1)
    lt = lt_ref[...]                                              # (S, S)

    def _recip(x):
        return pl.reciprocal(x, approx=True) if approx_recip else 1.0 / x

    # ---- heads: static loop (H is small); per-head temporaries are (Tq, S),
    # die inside the iteration and results land in static column slices of the
    # (Tq, D) concat scratch so the out_proj below is a single K=D matmul.
    for h in range(n_heads):
        sl = slice(h * d_k, (h + 1) * d_k)
        q_h = q_proj[:, sl]                                       # (Tq, Dk) f32
        k_h = k_scr[:, sl]                                        # (S, Dk) f32
        v_h = v_scr[:, sl]                                        # (S, Dk)

        # scores = q_h . k_h^T (contract Dk, no transpose of k), f32.
        scores = lax.dot_general(q_h, k_h, (((1,), (1,)), ((), ())),
                                 preferred_element_type=f32)      # (Tq, S)

        # "no-grad" branch: masked softmax, then suffix-sum distance statistic.
        masked = jnp.where(allowed, scores, neg_inf)
        m1 = jnp.max(masked, axis=-1, keepdims=True)
        e1 = jnp.exp(masked - m1)
        inv1 = _recip(jnp.sum(e1, axis=-1, keepdims=True))
        # mask_f is load-bearing: zeroes fully-masked rows (row 0, mask==0).
        scores_ = e1 * inv1 * mask_f

        # disttotal - distcum == suffix sum == scores_ @ strictly_lower_tri.
        suffix = jnp.dot(scores_.astype(compute_dtype), lt,
                         preferred_element_type=f32)              # (Tq, S)
        dist = jnp.sqrt(jnp.maximum(suffix * pos_eff, 0.0))
        total_effect = jnp.clip(jnp.exp(dist * neg_gamma_ref[h]), 1e-5, 1e5)

        # second (real) softmax with the monotonic distance decay applied.
        scores2 = jnp.where(allowed, scores * total_effect, neg_inf)
        m2 = jnp.max(scores2, axis=-1, keepdims=True)
        e2 = jnp.exp(scores2 - m2)
        inv2 = _recip(jnp.sum(e2, axis=-1, keepdims=True))

        # normalization + zero_pad folded into the (Tq, Dk) output.
        out_h = jnp.dot(e2.astype(compute_dtype), v_h,
                        preferred_element_type=f32) * inv2        # (Tq, Dk)
        if zero_pad:
            out_h = jnp.where(row0, 0.0, out_h)
        concat_scr[:, sl] = out_h.astype(concat_scr.dtype)

    # ---- out_proj: ONE (Tq, D) @ (D, D) matmul over concatenated heads ------
    attn_out = jnp.dot(concat_scr[...], wo_ref[...],
                       preferred_element_type=f32) + bo_ref[...].astype(f32)

    # ---- residual + LayerNorm1 (dropout1: eval identity) ---------------------
    y = x_tile + attn_out
    mu1 = jnp.mean(y, axis=-1, keepdims=True)
    yc = y - mu1
    var1 = jnp.mean(yc * yc, axis=-1, keepdims=True)
    y = yc * lax.rsqrt(var1 + eps) * ln1_w_ref[...] + ln1_b_ref[...]

    # ---- FFN + residual + LayerNorm2 (dropout / dropout2: identity) ----------
    if apply_pos:
        hid = jnp.maximum(
            jnp.dot(y.astype(compute_dtype), w1_ref[...],
                    preferred_element_type=f32) + b1_ref[...].astype(f32), 0.0)
        ffn = jnp.dot(hid.astype(compute_dtype), w2_ref[...],
                      preferred_element_type=f32) + b2_ref[...].astype(f32)
        z = y + ffn
        mu2 = jnp.mean(z, axis=-1, keepdims=True)
        zc = z - mu2
        var2 = jnp.mean(zc * zc, axis=-1, keepdims=True)
        y = zc * lax.rsqrt(var2 + eps) * ln2_w_ref[...] + ln2_b_ref[...]

    o_ref[0] = y.astype(o_ref.dtype)


# -----------------------------------------------------------------------------
# Generation-aware VMEM budget
# -----------------------------------------------------------------------------
def _vmem_ceiling_bytes():
    phys = 128 * 1024 * 1024
    try:
        info = pltpu.get_tpu_info()
        for attr in ("vmem_capacity_bytes", "vmem_bytes", "vmem_size_bytes"):
            v = getattr(info, attr, None)
            if v:
                phys = int(v)
                break
    except Exception:
        pass
    # Leave ~25% of physical VMEM for compiler-internal scratch:
    # -> ~48 MiB on v7x (64 MiB physical), ~96 MiB on v5e/v6e (128 MiB).
    return (phys * 3) // 4


# -----------------------------------------------------------------------------
# TransformerLayer forward (wrapper / glue)
# -----------------------------------------------------------------------------
def transformer_layer_forward(params, mask_int, query, key, values, *,
                              n_heads, kq_same=True, apply_pos=True,
                              use_bf16_matmul=False, tq_target=None):
    B, S, D = query.shape
    d_k = D // n_heads
    d_ff = params["w1"].shape[1]
    compute_dtype = jnp.bfloat16 if use_bf16_matmul else jnp.float32
    wbytes = jnp.dtype(compute_dtype).itemsize

    vmem_ceiling = _vmem_ceiling_bytes()
    # v7x has half the VMEM of v5e/v6e -> use half-size query tiles there.
    if tq_target is None:
        tq_target = 128 if vmem_ceiling < (64 << 20) else 256
    tq = S if S <= tq_target else max(8, (tq_target // 8) * 8)
    n_qt = pl.cdiv(S, tq)

    neg_gamma = (-jax.nn.softplus(params["gammas"])).astype(jnp.float32)   # (H,)
    q_w = params["k_w"] if kq_same else params["q_w"]
    q_b = params["k_b"] if kq_same else params["q_b"]

    # Strictly-lower-triangular ones: (scores_ @ lt)[i, j] = sum_{k > j} scores_[i, k]
    lt = (jnp.arange(S)[:, None] > jnp.arange(S)[None, :]).astype(compute_dtype)

    wo = params["wo"].astype(compute_dtype)
    w1 = params["w1"].astype(compute_dtype)
    w2 = params["w2"].astype(compute_dtype)

    zero_pad = (int(mask_int) == 0)
    kernel = functools.partial(
        _fused_layer_kernel, n_heads=n_heads, d_k=d_k, mask_int=int(mask_int),
        zero_pad=zero_pad, apply_pos=apply_pos, compute_dtype=compute_dtype,
        approx_recip=use_bf16_matmul)

    def const(shape):                       # weight blocks: index never changes
        return pl.BlockSpec(shape, lambda b, q: tuple(0 for _ in shape))

    in_specs = [
        pl.BlockSpec(memory_space=pltpu.MemorySpace.SMEM),         # neg_gamma (H,)
        pl.BlockSpec((1, tq, D), lambda b, q: (b, q, 0)),          # query tile
        pl.BlockSpec((1, S, D), lambda b, q: (b, 0, 0)),           # key (full S)
        pl.BlockSpec((1, S, D), lambda b, q: (b, 0, 0)),           # values (full S)
        const((D, D)), const((1, D)),                              # q_w, q_b
        const((D, D)), const((1, D)),                              # k_w, k_b
        const((D, D)), const((1, D)),                              # v_w, v_b
        const((S, S)),                                             # lt
        const((D, D)), const((1, D)),                              # wo, bo
        const((1, D)), const((1, D)),                              # ln1_w, ln1_b
        const((D, d_ff)), const((1, d_ff)),                        # w1, b1
        const((d_ff, D)), const((1, D)),                           # w2, b2
        const((1, D)), const((1, D)),                              # ln2_w, ln2_b
    ]

    # VMEM footprint of the tiled kernel (double-buffered pipeline blocks +
    # resident weights/scratch + in-kernel (Tq,S) temporaries) with headroom.
    est = (2 * 2 * tq * D * 4                       # query-in + out blocks
           + 2 * 2 * S * D * 4                      # key + values blocks
           + 2 * 3 * D * D * 4 + 2 * D * D * wbytes  # q/k/v weights + wo
           + 2 * 2 * D * d_ff * wbytes              # w1 + w2
           + 2 * S * S * wbytes                     # lt
           + S * D * (4 + wbytes) + tq * D * wbytes  # k/v/concat scratch
           + 10 * tq * S * 4                        # (Tq,S) temporaries
           + 8 * tq * max(D, d_ff) * 4              # (Tq,D)/(Tq,d_ff) temporaries
           + 64 * 1024)                             # biases / LN vectors
    vmem_limit = int(min(vmem_ceiling, max(est + (2 << 20), 16 << 20)))

    return pl.pallas_call(
        kernel,
        out_shape=jax.ShapeDtypeStruct((B, S, D), jnp.float32),
        grid=(B, n_qt),
        in_specs=in_specs,
        out_specs=pl.BlockSpec((1, tq, D), lambda b, q: (b, q, 0)),
        scratch_shapes=[
            pltpu.VMEM((S, D), jnp.float32),        # cached k projection (f32 scores)
            pltpu.VMEM((S, D), compute_dtype),      # cached v projection
            pltpu.VMEM((tq, D), compute_dtype),     # per-head concat buffer
        ],
        compiler_params=pltpu.CompilerParams(
            # B is megacore-parallel; the query-tile axis must stay sequential
            # because the per-batch k/v projection cache is reused across tiles.
            dimension_semantics=("parallel", "arbitrary"),
            vmem_limit_bytes=vmem_limit),
    )(neg_gamma, query, key, values, q_w, q_b, params["k_w"], params["k_b"],
      params["v_w"], params["v_b"], lt, wo, params["bo"],
      params["ln1_w"], params["ln1_b"], w1, params["b1"], w2, params["b2"],
      params["ln2_w"], params["ln2_b"])


# -----------------------------------------------------------------------------
# Pure-JAX reference (mirrors the PyTorch forward, eval mode)
# -----------------------------------------------------------------------------
def ref_forward(params, mask_int, query, key, values, *,
                n_heads, kq_same=True, apply_pos=True):
    B, S, D = query.shape
    d_k = D // n_heads
    k = key @ params["k_w"] + params["k_b"]
    q = (query @ params["k_w"] + params["k_b"]) if kq_same else \
        (query @ params["q_w"] + params["q_b"])
    v = values @ params["v_w"] + params["v_b"]

    def sh(x):
        return x.reshape(B, S, n_heads, d_k).transpose(0, 2, 1, 3)

    q, k, v = sh(q), sh(k), sh(v)
    scores = q @ k.transpose(0, 1, 3, 2) / math.sqrt(d_k)
    row = jnp.arange(S)[:, None]
    col = jnp.arange(S)[None, :]
    mask = ((col - row) < mask_int).astype(jnp.float32)[None, None]
    scores_ = jnp.where(mask == 0, -1e32, scores)
    scores_ = jax.nn.softmax(scores_, axis=-1) * mask
    distcum = jnp.cumsum(scores_, axis=-1)
    disttotal = jnp.sum(scores_, axis=-1, keepdims=True)
    pos = jnp.abs(col - row).astype(jnp.float32)[None, None]
    dist = jnp.sqrt(jnp.maximum((disttotal - distcum) * pos, 0.0))
    gamma = (-jax.nn.softplus(params["gammas"]))[None, :, None, None]
    total = jnp.clip(jnp.exp(dist * gamma), 1e-5, 1e5)
    scores = jnp.where(mask == 0, -1e32, scores * total)
    scores = jax.nn.softmax(scores, axis=-1)
    if mask_int == 0:
        scores = scores.at[:, :, 0, :].set(0.0)
    out = scores @ v
    concat = out.transpose(0, 2, 1, 3).reshape(B, S, D)

    def ln(x, w, b):
        mu = jnp.mean(x, axis=-1, keepdims=True)
        var = jnp.mean((x - mu) ** 2, axis=-1, keepdims=True)
        return (x - mu) / jnp.sqrt(var + 1e-5) * w + b

    x = ln(query + (concat @ params["wo"] + params["bo"]),
           params["ln1_w"], params["ln1_b"])
    if apply_pos:
        h = jax.nn.relu(x @ params["w1"] + params["b1"])
        ffn = h @ params["w2"] + params["b2"]
        x = ln(x + ffn, params["ln2_w"], params["ln2_b"])
    return x


# -----------------------------------------------------------------------------
# Deterministic parameter init (matches module shapes; synthetic, not a ckpt)
# -----------------------------------------------------------------------------
def init_params(key, D, H, d_ff):
    ks = jax.random.split(key, 10)

    def xavier(k, shape):
        fan_in, fan_out = shape
        a = math.sqrt(6.0 / (fan_in + fan_out))
        return jax.random.uniform(k, shape, jnp.float32, -a, a)

    def default_linear(kw, kb, fan_in, fan_out):
        bound = 1.0 / math.sqrt(fan_in)
        w = jax.random.uniform(kw, (fan_in, fan_out), jnp.float32, -bound, bound)
        b = jax.random.uniform(kb, (1, fan_out), jnp.float32, -bound, bound)
        return w, b

    p = {}
    # Weights stored as (in, out); PyTorch Linear does x @ W.T, equivalent here.
    p["k_w"] = xavier(ks[0], (D, D)); p["k_b"] = jnp.zeros((1, D), jnp.float32)
    p["v_w"] = xavier(ks[1], (D, D)); p["v_b"] = jnp.zeros((1, D), jnp.float32)
    p["q_w"] = xavier(ks[2], (D, D)); p["q_b"] = jnp.zeros((1, D), jnp.float32)
    bound = 1.0 / math.sqrt(D)
    p["wo"] = jax.random.uniform(ks[3], (D, D), jnp.float32, -bound, bound)
    p["bo"] = jnp.zeros((1, D), jnp.float32)
    a_g = math.sqrt(6.0 / (1 + H))                   # xavier on (H,1,1) gammas
    p["gammas"] = jax.random.uniform(ks[4], (H,), jnp.float32, -a_g, a_g)
    p["w1"], p["b1"] = default_linear(ks[5], ks[6], D, d_ff)
    p["w2"], p["b2"] = default_linear(ks[7], ks[8], d_ff, D)
    p["ln1_w"] = jnp.ones((1, D), jnp.float32)
    p["ln1_b"] = jnp.zeros((1, D), jnp.float32)
    p["ln2_w"] = jnp.ones((1, D), jnp.float32)
    p["ln2_b"] = jnp.zeros((1, D), jnp.float32)
    return p


if __name__ == "__main__":
    # Small shapes consistent with the module: d_model = n_heads * d_feature.
    B, S, D, H, d_ff = 2, 8, 32, 4, 64
    mask_int = 0          # mask==0 -> strictly-causal src_mask + zero_pad=True
    kq_same = True        # kq_same == 1 in TransformerLayer.__init__

    root = jax.random.PRNGKey(0)
    kp, kq, kk, kv = jax.random.split(root, 4)
    params = init_params(kp, D, H, d_ff)
    query = jax.random.normal(kq, (B, S, D), jnp.float32)
    key_in = jax.random.normal(kk, (B, S, D), jnp.float32)
    values = jax.random.normal(kv, (B, S, D), jnp.float32)

    ref = ref_forward(params, mask_int, query, key_in, values,
                      n_heads=H, kq_same=kq_same, apply_pos=True)

    # f32 path, single query tile.
    out = transformer_layer_forward(params, mask_int, query, key_in, values,
                                    n_heads=H, kq_same=kq_same, apply_pos=True,
                                    use_bf16_matmul=False)
    out = jax.block_until_ready(out)
    assert out.shape == (B, S, D)
    assert jnp.allclose(out, ref, rtol=1e-3, atol=1e-3), \
        f"f32 path max abs diff {jnp.max(jnp.abs(out - ref))}"

    # bf16-MXU path (f32 accumulation, f32 q.k^T scores): looser tolerance.
    out_bf16 = transformer_layer_forward(params, mask_int, query, key_in,
                                         values, n_heads=H, kq_same=kq_same,
                                         apply_pos=True, use_bf16_matmul=True)
    out_bf16 = jax.block_until_ready(out_bf16)
    assert jnp.allclose(out_bf16, ref, rtol=5e-2, atol=5e-2), \
        f"bf16 path max abs diff {jnp.max(jnp.abs(out_bf16 - ref))}"

    # Multi-tile grid (2 query tiles) + mask=1 branch: exercises the per-batch
    # k/v projection cache across query tiles and the non-zero_pad path.
    S2 = 16
    kq2, kk2, kv2 = jax.random.split(jax.random.PRNGKey(1), 3)
    query2 = jax.random.normal(kq2, (B, S2, D), jnp.float32)
    key2 = jax.random.normal(kk2, (B, S2, D), jnp.float32)
    values2 = jax.random.normal(kv2, (B, S2, D), jnp.float32)
    ref2 = ref_forward(params, 1, query2, key2, values2,
                       n_heads=H, kq_same=kq_same, apply_pos=True)
    out2 = transformer_layer_forward(params, 1, query2, key2, values2,
                                     n_heads=H, kq_same=kq_same, apply_pos=True,
                                     use_bf16_matmul=False, tq_target=8)
    out2 = jax.block_until_ready(out2)
    assert jnp.allclose(out2, ref2, rtol=1e-3, atol=1e-3), \
        f"tiled path max abs diff {jnp.max(jnp.abs(out2 - ref2))}"

    # TODO(synk): dropout layers are modeled as eval-mode identity (no RNG).
    print("KERNEL_OK")
</pallas_src>

<mosaic_0001>
module attributes {stable_mosaic.version = 11 : i64} {
  func.func @_fused_layer_kernel(%arg0: i32, %arg1: i32, %arg2: memref<4xf32, #tpu.memory_space<smem>>, %arg3: memref<1x8x32xf32, #tpu.memory_space<vmem>>, %arg4: memref<1x8x32xf32, #tpu.memory_space<vmem>>, %arg5: memref<1x8x32xf32, #tpu.memory_space<vmem>>, %arg6: memref<32x32xf32, #tpu.memory_space<vmem>>, %arg7: memref<1x32xf32, #tpu.memory_space<vmem>>, %arg8: memref<32x32xf32, #tpu.memory_space<vmem>>, %arg9: memref<1x32xf32, #tpu.memory_space<vmem>>, %arg10: memref<32x32xf32, #tpu.memory_space<vmem>>, %arg11: memref<1x32xf32, #tpu.memory_space<vmem>>, %arg12: memref<8x8xf32, #tpu.memory_space<vmem>>, %arg13: memref<32x32xf32, #tpu.memory_space<vmem>>, %arg14: memref<1x32xf32, #tpu.memory_space<vmem>>, %arg15: memref<1x32xf32, #tpu.memory_space<vmem>>, %arg16: memref<1x32xf32, #tpu.memory_space<vmem>>, %arg17: memref<32x64xf32, #tpu.memory_space<vmem>>, %arg18: memref<1x64xf32, #tpu.memory_space<vmem>>, %arg19: memref<64x32xf32, #tpu.memory_space<vmem>>, %arg20: memref<1x32xf32, #tpu.memory_space<vmem>>, %arg21: memref<1x32xf32, #tpu.memory_space<vmem>>, %arg22: memref<1x32xf32, #tpu.memory_space<vmem>>, %arg23: memref<1x8x32xf32, #tpu.memory_space<vmem>>, %arg24: memref<8x32xf32, #tpu.memory_space<vmem>>, %arg25: memref<8x32xf32, #tpu.memory_space<vmem>>, %arg26: memref<8x32xf32, #tpu.memory_space<vmem>>) attributes {dimension_semantics = [#tpu.dimension_semantics<parallel>, #tpu.dimension_semantics<arbitrary>], iteration_bounds = array<i64: 2, 1>, scalar_prefetch = 0 : i64, scratch_operands = 3 : i64, tpu.core_type = #tpu.core_type<tc>, window_params = [{transform_indices = @transform_0, window_bounds = array<i64: 4>}, {transform_indices = @transform_1, window_bounds = array<i64: 1, 8, 32>}, {transform_indices = @transform_2, window_bounds = array<i64: 1, 8, 32>}, {transform_indices = @transform_3, window_bounds = array<i64: 1, 8, 32>}, {pipeline_mode = #tpu.pipeline_mode<synchronous>, transform_indices = @transform_4, window_bounds = array<i64: 32, 32>}, {pipeline_mode = #tpu.pipeline_mode<synchronous>, transform_indices = @transform_5, window_bounds = array<i64: 1, 32>}, {pipeline_mode = #tpu.pipeline_mode<synchronous>, transform_indices = @transform_6, window_bounds = array<i64: 32, 32>}, {pipeline_mode = #tpu.pipeline_mode<synchronous>, transform_indices = @transform_7, window_bounds = array<i64: 1, 32>}, {pipeline_mode = #tpu.pipeline_mode<synchronous>, transform_indices = @transform_8, window_bounds = array<i64: 32, 32>}, {pipeline_mode = #tpu.pipeline_mode<synchronous>, transform_indices = @transform_9, window_bounds = array<i64: 1, 32>}, {pipeline_mode = #tpu.pipeline_mode<synchronous>, transform_indices = @transform_10, window_bounds = array<i64: 8, 8>}, {pipeline_mode = #tpu.pipeline_mode<synchronous>, transform_indices = @transform_11, window_bounds = array<i64: 32, 32>}, {pipeline_mode = #tpu.pipeline_mode<synchronous>, transform_indices = @transform_12, window_bounds = array<i64: 1, 32>}, {pipeline_mode = #tpu.pipeline_mode<synchronous>, transform_indices = @transform_13, window_bounds = array<i64: 1, 32>}, {pipeline_mode = #tpu.pipeline_mode<synchronous>, transform_indices = @transform_14, window_bounds = array<i64: 1, 32>}, {pipeline_mode = #tpu.pipeline_mode<synchronous>, transform_indices = @transform_15, window_bounds = array<i64: 32, 64>}, {pipeline_mode = #tpu.pipeline_mode<synchronous>, transform_indices = @transform_16, window_bounds = array<i64: 1, 64>}, {pipeline_mode = #tpu.pipeline_mode<synchronous>, transform_indices = @transform_17, window_bounds = array<i64: 64, 32>}, {pipeline_mode = #tpu.pipeline_mode<synchronous>, transform_indices = @transform_18, window_bounds = array<i64: 1, 32>}, {pipeline_mode = #tpu.pipeline_mode<synchronous>, transform_indices = @transform_19, window_bounds = array<i64: 1, 32>}, {pipeline_mode = #tpu.pipeline_mode<synchronous>, transform_indices = @transform_20, window_bounds = array<i64: 1, 32>}, {transform_indices = @transform_21, window_bounds = array<i64: 1, 8, 32>}]} {
    %c0_i32 = arith.constant 0 : i32
    %0 = arith.cmpi eq, %arg1, %c0_i32 : i32
    %1 = arith.extui %0 : i1 to i32
    %c0_i32_0 = arith.constant 0 : i32
    %2 = arith.cmpi ne, %1, %c0_i32_0 : i32
    scf.if %2 {
      %c0_133 = arith.constant 0 : index
      %c0_134 = arith.constant 0 : index
      %c0_135 = arith.constant 0 : index
      %300 = vector.load %arg4[%c0_133, %c0_134, %c0_135] : memref<1x8x32xf32, #tpu.memory_space<vmem>>, vector<1x8x32xf32>
      %301 = vector.shape_cast %300 : vector<1x8x32xf32> to vector<8x32xf32>
      %c0_136 = arith.constant 0 : index
      %c0_137 = arith.constant 0 : index
      %302 = vector.load %arg8[%c0_136, %c0_137] : memref<32x32xf32, #tpu.memory_space<vmem>>, vector<32x32xf32>
      %cst_138 = arith.constant dense<0.000000e+00> : vector<8x32xf32>
      %303 = tpu.matmul %301, %302, %cst_138 {dimension_numbers = #tpu.dot_dimension_numbers<[1], [0], [0], [1], [0, 0, 1, 1], [], []>} : vector<8x32xf32>, vector<32x32xf32>, vector<8x32xf32> -> vector<8x32xf32>
      %c0_139 = arith.constant 0 : index
      %c0_140 = arith.constant 0 : index
      %304 = vector.load %arg9[%c0_139, %c0_140] : memref<1x32xf32, #tpu.memory_space<vmem>>, vector<1x32xf32>
      %305 = vector.broadcast %304 : vector<1x32xf32> to vector<8x32xf32>
      %306 = arith.addf %303, %305 : vector<8x32xf32>
      %c0_141 = arith.constant 0 : index
      %c0_142 = arith.constant 0 : index
      %307 = vector.load %arg24[%c0_141, %c0_142] : memref<8x32xf32, #tpu.memory_space<vmem>>, vector<8x32xf32>
      tpu.vector_store %arg24[%c0_141, %c0_142], %306 {strides = array<i32>} : memref<8x32xf32, #tpu.memory_space<vmem>>, vector<8x32xf32>,
      %c0_143 = arith.constant 0 : index
      %c0_144 = arith.constant 0 : index
      %c0_145 = arith.constant 0 : index
      %308 = vector.load %arg5[%c0_143, %c0_144, %c0_145] : memref<1x8x32xf32, #tpu.memory_space<vmem>>, vector<1x8x32xf32>
      %309 = vector.shape_cast %308 : vector<1x8x32xf32> to vector<8x32xf32>
      %c0_146 = arith.constant 0 : index
      %c0_147 = arith.constant 0 : index
      %310 = vector.load %arg10[%c0_146, %c0_147] : memref<32x32xf32, #tpu.memory_space<vmem>>, vector<32x32xf32>
      %cst_148 = arith.constant dense<0.000000e+00> : vector<8x32xf32>
      %311 = tpu.matmul %309, %310, %cst_148 {dimension_numbers = #tpu.dot_dimension_numbers<[1], [0], [0], [1], [0, 0, 1, 1], [], []>} : vector<8x32xf32>, vector<32x32xf32>, vector<8x32xf32> -> vector<8x32xf32>
      %c0_149 = arith.constant 0 : index
      %c0_150 = arith.constant 0 : index
      %312 = vector.load %arg11[%c0_149, %c0_150] : memref<1x32xf32, #tpu.memory_space<vmem>>, vector<1x32xf32>
      %313 = vector.broadcast %312 : vector<1x32xf32> to vector<8x32xf32>
      %314 = arith.addf %311, %313 : vector<8x32xf32>
      %c0_151 = arith.constant 0 : index
      %c0_152 = arith.constant 0 : index
      %315 = vector.load %arg25[%c0_151, %c0_152] : memref<8x32xf32, #tpu.memory_space<vmem>>, vector<8x32xf32>
      tpu.vector_store %arg25[%c0_151, %c0_152], %314 {strides = array<i32>} : memref<8x32xf32, #tpu.memory_space<vmem>>, vector<8x32xf32>,
    } else {
    }
    %c0 = arith.constant 0 : index
    %c0_1 = arith.constant 0 : index
    %c0_2 = arith.constant 0 : index
    %3 = vector.load %arg3[%c0, %c0_1, %c0_2] : memref<1x8x32xf32, #tpu.memory_space<vmem>>, vector<1x8x32xf32>
    %4 = vector.shape_cast %3 : vector<1x8x32xf32> to vector<8x32xf32>
    %c0_3 = arith.constant 0 : index
    %c0_4 = arith.constant 0 : index
    %5 = vector.load %arg6[%c0_3, %c0_4] : memref<32x32xf32, #tpu.memory_space<vmem>>, vector<32x32xf32>
    %cst = arith.constant dense<0.000000e+00> : vector<8x32xf32>
    %6 = tpu.matmul %4, %5, %cst {dimension_numbers = #tpu.dot_dimension_numbers<[1], [0], [0], [1], [0, 0, 1, 1], [], []>} : vector<8x32xf32>, vector<32x32xf32>, vector<8x32xf32> -> vector<8x32xf32>
    %c0_5 = arith.constant 0 : index
    %c0_6 = arith.constant 0 : index
    %7 = vector.load %arg7[%c0_5, %c0_6] : memref<1x32xf32, #tpu.memory_space<vmem>>, vector<1x32xf32>
    %8 = vector.broadcast %7 : vector<1x32xf32> to vector<8x32xf32>
    %9 = arith.addf %6, %8 : vector<8x32xf32>
    %cst_7 = arith.constant 0.353553385 : f32
    %10 = vector.broadcast %cst_7 : f32 to vector<8x32xf32>
    %11 = arith.mulf %9, %10 : vector<8x32xf32>
    %12 = tpu.iota {dimensions = array<i32: 0>} : vector<8x8xi32>
    %c8_i32 = arith.constant 8 : i32
    %13 = arith.muli %arg1, %c8_i32 : i32
    %14 = vector.broadcast %13 : i32 to vector<8x8xi32>
    %15 = arith.addi %12, %14 : vector<8x8xi32>
    %16 = tpu.iota {dimensions = array<i32: 1>} : vector<8x8xi32>
    %17 = arith.subi %16, %15 : vector<8x8xi32>
    %c0_i32_8 = arith.constant 0 : i32
    %18 = vector.broadcast %c0_i32_8 : i32 to vector<8x8xi32>
    %19 = arith.cmpi slt, %17, %18 : vector<8x8xi32>
    %20 = arith.extui %19 : vector<8x8xi1> to vector<8x8xi32>
    %21 = arith.sitofp %20 : vector<8x8xi32> to vector<8x8xf32>
    %22 = arith.subi %16, %15 : vector<8x8xi32>
    %23 = math.absi %22 : vector<8x8xi32>
    %24 = arith.sitofp %23 : vector<8x8xi32> to vector<8x8xf32>
    %25 = vector.extract_strided_slice %15 {offsets = [0, 0], sizes = [8, 1], strides = [1, 1]} : vector<8x8xi32> to vector<8x1xi32>
    %c0_i32_9 = arith.constant 0 : i32
    %26 = vector.broadcast %c0_i32_9 : i32 to vector<8x1xi32>
    %27 = arith.cmpi eq, %25, %26 : vector<8x1xi32>
    %c0_10 = arith.constant 0 : index
    %c0_11 = arith.constant 0 : index
    %28 = vector.load %arg12[%c0_10, %c0_11] : memref<8x8xf32, #tpu.memory_space<vmem>>, vector<8x8xf32>
    %29 = vector.extract_strided_slice %11 {offsets = [0, 0], sizes = [8, 8], strides = [1, 1]} : vector<8x32xf32> to vector<8x8xf32>
    %c0_12 = arith.constant 0 : index
    %c0_13 = arith.constant 0 : index
    %30 = vector.load %arg24[%c0_12, %c0_13] : memref<8x32xf32, #tpu.memory_space<vmem>>, vector<8x8xf32>
    %c0_14 = arith.constant 0 : index
    %c0_15 = arith.constant 0 : index
    %31 = vector.load %arg25[%c0_14, %c0_15] : memref<8x32xf32, #tpu.memory_space<vmem>>, vector<8x8xf32>
    %cst_16 = arith.constant dense<0.000000e+00> : vector<8x8xf32>
    %32 = tpu.matmul %29, %30, %cst_16 {dimension_numbers = #tpu.dot_dimension_numbers<[1], [1], [0], [0], [0, 0, 1, 0], [], []>} : vector<8x8xf32>, vector<8x8xf32>, vector<8x8xf32> -> vector<8x8xf32>
    %cst_17 = arith.constant -1.000000e+32 : f32
    %33 = vector.broadcast %cst_17 : f32 to vector<8x8xf32>
    %34 = arith.select %19, %32, %33 : vector<8x8xi1>, vector<8x8xf32>
    %cst_18 = arith.constant dense<0xFF800000> : vector<8xf32>
    %35 = vector.multi_reduction <maximumf>, %34, %cst_18 [1] : vector<8x8xf32> to vector<8xf32>
    %36 = vector.shape_cast %35 : vector<8xf32> to vector<8x1xf32>
    %37 = vector.broadcast %36 : vector<8x1xf32> to vector<8x8xf32>
    %38 = arith.subf %34, %37 : vector<8x8xf32>
    %39 = math.exp %38 : vector<8x8xf32>
    %cst_19 = arith.constant dense<0.000000e+00> : vector<8xf32>
    %40 = vector.multi_reduction <add>, %39, %cst_19 [1] : vector<8x8xf32> to vector<8xf32>
    %41 = vector.shape_cast %40 : vector<8xf32> to vector<8x1xf32>
    %cst_20 = arith.constant 1.000000e+00 : f32
    %42 = vector.broadcast %cst_20 : f32 to vector<8x1xf32>
    %43 = arith.divf %42, %41 : vector<8x1xf32>
    %44 = vector.broadcast %43 : vector<8x1xf32> to vector<8x8xf32>
    %45 = arith.mulf %39, %44 : vector<8x8xf32>
    %46 = arith.mulf %45, %21 : vector<8x8xf32>
    %cst_21 = arith.constant dense<0.000000e+00> : vector<8x8xf32>
    %47 = tpu.matmul %46, %28, %cst_21 {dimension_numbers = #tpu.dot_dimension_numbers<[1], [0], [0], [1], [0, 0, 1, 1], [], []>} : vector<8x8xf32>, vector<8x8xf32>, vector<8x8xf32> -> vector<8x8xf32>
    %48 = arith.mulf %47, %24 : vector<8x8xf32>
    %cst_22 = arith.constant 0.000000e+00 : f32
    %49 = vector.broadcast %cst_22 : f32 to vector<8x8xf32>
    %50 = arith.maximumf %48, %49 : vector<8x8xf32>
    %51 = math.sqrt %50 : vector<8x8xf32>
    %c0_23 = arith.constant 0 : index
    %52 = memref.load %arg2[%c0_23] : memref<4xf32, #tpu.memory_space<smem>>
    %53 = vector.broadcast %52 : f32 to vector<8x8xf32>
    %54 = arith.mulf %51, %53 : vector<8x8xf32>
    %55 = math.exp %54 : vector<8x8xf32>
    %cst_24 = arith.constant 9.99999974E-6 : f32
    %cst_25 = arith.constant 1.000000e+05 : f32
    %56 = vector.broadcast %cst_24 : f32 to vector<8x8xf32>
    %57 = arith.maximumf %56, %55 : vector<8x8xf32>
    %58 = vector.broadcast %cst_25 : f32 to vector<8x8xf32>
    %59 = arith.minimumf %58, %57 : vector<8x8xf32>
    %60 = arith.mulf %32, %59 : vector<8x8xf32>
    %cst_26 = arith.constant -1.000000e+32 : f32
    %61 = vector.broadcast %cst_26 : f32 to vector<8x8xf32>
    %62 = arith.select %19, %60, %61 : vector<8x8xi1>, vector<8x8xf32>
    %cst_27 = arith.constant dense<0xFF800000> : vector<8xf32>
    %63 = vector.multi_reduction <maximumf>, %62, %cst_27 [1] : vector<8x8xf32> to vector<8xf32>
    %64 = vector.shape_cast %63 : vector<8xf32> to vector<8x1xf32>
    %65 = vector.broadcast %64 : vector<8x1xf32> to vector<8x8xf32>
    %66 = arith.subf %62, %65 : vector<8x8xf32>
    %67 = math.exp %66 : vector<8x8xf32>
    %cst_28 = arith.constant dense<0.000000e+00> : vector<8xf32>
    %68 = vector.multi_reduction <add>, %67, %cst_28 [1] : vector<8x8xf32> to vector<8xf32>
    %69 = vector.shape_cast %68 : vector<8xf32> to vector<8x1xf32>
    %cst_29 = arith.constant 1.000000e+00 : f32
    %70 = vector.broadcast %cst_29 : f32 to vector<8x1xf32>
    %71 = arith.divf %70, %69 : vector<8x1xf32>
    %cst_30 = arith.constant dense<0.000000e+00> : vector<8x8xf32>
    %72 = tpu.matmul %67, %31, %cst_30 {dimension_numbers = #tpu.dot_dimension_numbers<[1], [0], [0], [1], [0, 0, 1, 1], [], []>} : vector<8x8xf32>, vector<8x8xf32>, vector<8x8xf32> -> vector<8x8xf32>
    %73 = vector.broadcast %71 : vector<8x1xf32> to vector<8x8xf32>
    %74 = arith.mulf %72, %73 : vector<8x8xf32>
    %cst_31 = arith.constant 0.000000e+00 : f32
    %75 = vector.shape_cast %27 : vector<8x1xi1> to vector<8x1xi1>
    %76 = vector.broadcast %75 : vector<8x1xi1> to vector<8x8xi1>
    %77 = vector.broadcast %cst_31 : f32 to vector<8x8xf32>
    %78 = arith.select %76, %77, %74 : vector<8x8xi1>, vector<8x8xf32>
    %c0_32 = arith.constant 0 : index
    %c0_33 = arith.constant 0 : index
    %79 = vector.load %arg26[%c0_32, %c0_33] : memref<8x32xf32, #tpu.memory_space<vmem>>, vector<8x8xf32>
    tpu.vector_store %arg26[%c0_32, %c0_33], %78 {strides = array<i32>} : memref<8x32xf32, #tpu.memory_space<vmem>>, vector<8x8xf32>,
    %80 = vector.extract_strided_slice %11 {offsets = [0, 8], sizes = [8, 8], strides = [1, 1]} : vector<8x32xf32> to vector<8x8xf32>
    %c0_34 = arith.constant 0 : index
    %c8 = arith.constant 8 : index
    %81 = vector.load %arg24[%c0_34, %c8] : memref<8x32xf32, #tpu.memory_space<vmem>>, vector<8x8xf32>
    %c0_35 = arith.constant 0 : index
    %c8_36 = arith.constant 8 : index
    %82 = vector.load %arg25[%c0_35, %c8_36] : memref<8x32xf32, #tpu.memory_space<vmem>>, vector<8x8xf32>
    %cst_37 = arith.constant dense<0.000000e+00> : vector<8x8xf32>
    %83 = tpu.matmul %80, %81, %cst_37 {dimension_numbers = #tpu.dot_dimension_numbers<[1], [1], [0], [0], [0, 0, 1, 0], [], []>} : vector<8x8xf32>, vector<8x8xf32>, vector<8x8xf32> -> vector<8x8xf32>
    %cst_38 = arith.constant -1.000000e+32 : f32
    %84 = vector.broadcast %cst_38 : f32 to vector<8x8xf32>
    %85 = arith.select %19, %83, %84 : vector<8x8xi1>, vector<8x8xf32>
    %cst_39 = arith.constant dense<0xFF800000> : vector<8xf32>
    %86 = vector.multi_reduction <maximumf>, %85, %cst_39 [1] : vector<8x8xf32> to vector<8xf32>
    %87 = vector.shape_cast %86 : vector<8xf32> to vector<8x1xf32>
    %88 = vector.broadcast %87 : vector<8x1xf32> to vector<8x8xf32>
    %89 = arith.subf %85, %88 : vector<8x8xf32>
    %90 = math.exp %89 : vector<8x8xf32>
    %cst_40 = arith.constant dense<0.000000e+00> : vector<8xf32>
    %91 = vector.multi_reduction <add>, %90, %cst_40 [1] : vector<8x8xf32> to vector<8xf32>
    %92 = vector.shape_cast %91 : vector<8xf32> to vector<8x1xf32>
    %cst_41 = arith.constant 1.000000e+00 : f32
    %93 = vector.broadcast %cst_41 : f32 to vector<8x1xf32>
    %94 = arith.divf %93, %92 : vector<8x1xf32>
    %95 = vector.broadcast %94 : vector<8x1xf32> to vector<8x8xf32>
    %96 = arith.mulf %90, %95 : vector<8x8xf32>
    %97 = arith.mulf %96, %21 : vector<8x8xf32>
    %cst_42 = arith.constant dense<0.000000e+00> : vector<8x8xf32>
    %98 = tpu.matmul %97, %28, %cst_42 {dimension_numbers = #tpu.dot_dimension_numbers<[1], [0], [0], [1], [0, 0, 1, 1], [], []>} : vector<8x8xf32>, vector<8x8xf32>, vector<8x8xf32> -> vector<8x8xf32>
    %99 = arith.mulf %98, %24 : vector<8x8xf32>
    %cst_43 = arith.constant 0.000000e+00 : f32
    %100 = vector.broadcast %cst_43 : f32 to vector<8x8xf32>
    %101 = arith.maximumf %99, %100 : vector<8x8xf32>
    %102 = math.sqrt %101 : vector<8x8xf32>
    %c1 = arith.constant 1 : index
    %103 = memref.load %arg2[%c1] : memref<4xf32, #tpu.memory_space<smem>>
    %104 = vector.broadcast %103 : f32 to vector<8x8xf32>
    %105 = arith.mulf %102, %104 : vector<8x8xf32>
    %106 = math.exp %105 : vector<8x8xf32>
    %cst_44 = arith.constant 9.99999974E-6 : f32
    %cst_45 = arith.constant 1.000000e+05 : f32
    %107 = vector.broadcast %cst_44 : f32 to vector<8x8xf32>
    %108 = arith.maximumf %107, %106 : vector<8x8xf32>
    %109 = vector.broadcast %cst_45 : f32 to vector<8x8xf32>
    %110 = arith.minimumf %109, %108 : vector<8x8xf32>
    %111 = arith.mulf %83, %110 : vector<8x8xf32>
    %cst_46 = arith.constant -1.000000e+32 : f32
    %112 = vector.broadcast %cst_46 : f32 to vector<8x8xf32>
    %113 = arith.select %19, %111, %112 : vector<8x8xi1>, vector<8x8xf32>
    %cst_47 = arith.constant dense<0xFF800000> : vector<8xf32>
    %114 = vector.multi_reduction <maximumf>, %113, %cst_47 [1] : vector<8x8xf32> to vector<8xf32>
    %115 = vector.shape_cast %114 : vector<8xf32> to vector<8x1xf32>
    %116 = vector.broadcast %115 : vector<8x1xf32> to vector<8x8xf32>
    %117 = arith.subf %113, %116 : vector<8x8xf32>
    %118 = math.exp %117 : vector<8x8xf32>
    %cst_48 = arith.constant dense<0.000000e+00> : vector<8xf32>
    %119 = vector.multi_reduction <add>, %118, %cst_48 [1] : vector<8x8xf32> to vector<8xf32>
    %120 = vector.shape_cast %119 : vector<8xf32> to vector<8x1xf32>
    %cst_49 = arith.constant 1.000000e+00 : f32
    %121 = vector.broadcast %cst_49 : f32 to vector<8x1xf32>
    %122 = arith.divf %121, %120 : vector<8x1xf32>
    %cst_50 = arith.constant dense<0.000000e+00> : vector<8x8xf32>
    %123 = tpu.matmul %118, %82, %cst_50 {dimension_numbers = #tpu.dot_dimension_numbers<[1], [0], [0], [1], [0, 0, 1, 1], [], []>} : vector<8x8xf32>, vector<8x8xf32>, vector<8x8xf32> -> vector<8x8xf32>
    %124 = vector.broadcast %122 : vector<8x1xf32> to vector<8x8xf32>
    %125 = arith.mulf %123, %124 : vector<8x8xf32>
    %cst_51 = arith.constant 0.000000e+00 : f32
    %126 = vector.shape_cast %27 : vector<8x1xi1> to vector<8x1xi1>
    %127 = vector.broadcast %126 : vector<8x1xi1> to vector<8x8xi1>
    %128 = vector.broadcast %cst_51 : f32 to vector<8x8xf32>
    %129 = arith.select %127, %128, %125 : vector<8x8xi1>, vector<8x8xf32>
    %c0_52 = arith.constant 0 : index
    %c8_53 = arith.constant 8 : index
    %130 = vector.load %arg26[%c0_52, %c8_53] : memref<8x32xf32, #tpu.memory_space<vmem>>, vector<8x8xf32>
    tpu.vector_store %arg26[%c0_52, %c8_53], %129 {strides = array<i32>} : memref<8x32xf32, #tpu.memory_space<vmem>>, vector<8x8xf32>,
    %131 = vector.extract_strided_slice %11 {offsets = [0, 16], sizes = [8, 8], strides = [1, 1]} : vector<8x32xf32> to vector<8x8xf32>
    %c0_54 = arith.constant 0 : index
    %c16 = arith.constant 16 : index
    %132 = vector.load %arg24[%c0_54, %c16] : memref<8x32xf32, #tpu.memory_space<vmem>>, vector<8x8xf32>
    %c0_55 = arith.constant 0 : index
    %c16_56 = arith.constant 16 : index
    %133 = vector.load %arg25[%c0_55, %c16_56] : memref<8x32xf32, #tpu.memory_space<vmem>>, vector<8x8xf32>
    %cst_57 = arith.constant dense<0.000000e+00> : vector<8x8xf32>
    %134 = tpu.matmul %131, %132, %cst_57 {dimension_numbers = #tpu.dot_dimension_numbers<[1], [1], [0], [0], [0, 0, 1, 0], [], []>} : vector<8x8xf32>, vector<8x8xf32>, vector<8x8xf32> -> vector<8x8xf32>
    %cst_58 = arith.constant -1.000000e+32 : f32
    %135 = vector.broadcast %cst_58 : f32 to vector<8x8xf32>
    %136 = arith.select %19, %134, %135 : vector<8x8xi1>, vector<8x8xf32>
    %cst_59 = arith.constant dense<0xFF800000> : vector<8xf32>
    %137 = vector.multi_reduction <maximumf>, %136, %cst_59 [1] : vector<8x8xf32> to vector<8xf32>
    %138 = vector.shape_cast %137 : vector<8xf32> to vector<8x1xf32>
    %139 = vector.broadcast %138 : vector<8x1xf32> to vector<8x8xf32>
    %140 = arith.subf %136, %139 : vector<8x8xf32>
    %141 = math.exp %140 : vector<8x8xf32>
    %cst_60 = arith.constant dense<0.000000e+00> : vector<8xf32>
    %142 = vector.multi_reduction <add>, %141, %cst_60 [1] : vector<8x8xf32> to vector<8xf32>
    %143 = vector.shape_cast %142 : vector<8xf32> to vector<8x1xf32>
    %cst_61 = arith.constant 1.000000e+00 : f32
    %144 = vector.broadcast %cst_61 : f32 to vector<8x1xf32>
    %145 = arith.divf %144, %143 : vector<8x1xf32>
    %146 = vector.broadcast %145 : vector<8x1xf32> to vector<8x8xf32>
    %147 = arith.mulf %141, %146 : vector<8x8xf32>
    %148 = arith.mulf %147, %21 : vector<8x8xf32>
    %cst_62 = arith.constant dense<0.000000e+00> : vector<8x8xf32>
    %149 = tpu.matmul %148, %28, %cst_62 {dimension_numbers = #tpu.dot_dimension_numbers<[1], [0], [0], [1], [0, 0, 1, 1], [], []>} : vector<8x8xf32>, vector<8x8xf32>, vector<8x8xf32> -> vector<8x8xf32>
    %150 = arith.mulf %149, %24 : vector<8x8xf32>
    %cst_63 = arith.constant 0.000000e+00 : f32
    %151 = vector.broadcast %cst_63 : f32 to vector<8x8xf32>
    %152 = arith.maximumf %150, %151 : vector<8x8xf32>
    %153 = math.sqrt %152 : vector<8x8xf32>
    %c2 = arith.constant 2 : index
    %154 = memref.load %arg2[%c2] : memref<4xf32, #tpu.memory_space<smem>>
    %155 = vector.broadcast %154 : f32 to vector<8x8xf32>
    %156 = arith.mulf %153, %155 : vector<8x8xf32>
    %157 = math.exp %156 : vector<8x8xf32>
    %cst_64 = arith.constant 9.99999974E-6 : f32
    %cst_65 = arith.constant 1.000000e+05 : f32
    %158 = vector.broadcast %cst_64 : f32 to vector<8x8xf32>
    %159 = arith.maximumf %158, %157 : vector<8x8xf32>
    %160 = vector.broadcast %cst_65 : f32 to vector<8x8xf32>
    %161 = arith.minimumf %160, %159 : vector<8x8xf32>
    %162 = arith.mulf %134, %161 : vector<8x8xf32>
    %cst_66 = arith.constant -1.000000e+32 : f32
    %163 = vector.broadcast %cst_66 : f32 to vector<8x8xf32>
    %164 = arith.select %19, %162, %163 : vector<8x8xi1>, vector<8x8xf32>
    %cst_67 = arith.constant dense<0xFF800000> : vector<8xf32>
    %165 = vector.multi_reduction <maximumf>, %164, %cst_67 [1] : vector<8x8xf32> to vector<8xf32>
    %166 = vector.shape_cast %165 : vector<8xf32> to vector<8x1xf32>
    %167 = vector.broadcast %166 : vector<8x1xf32> to vector<8x8xf32>
    %168 = arith.subf %164, %167 : vector<8x8xf32>
    %169 = math.exp %168 : vector<8x8xf32>
    %cst_68 = arith.constant dense<0.000000e+00> : vector<8xf32>
    %170 = vector.multi_reduction <add>, %169, %cst_68 [1] : vector<8x8xf32> to vector<8xf32>
    %171 = vector.shape_cast %170 : vector<8xf32> to vector<8x1xf32>
    %cst_69 = arith.constant 1.000000e+00 : f32
    %172 = vector.broadcast %cst_69 : f32 to vector<8x1xf32>
    %173 = arith.divf %172, %171 : vector<8x1xf32>
    %cst_70 = arith.constant dense<0.000000e+00> : vector<8x8xf32>
    %174 = tpu.matmul %169, %133, %cst_70 {dimension_numbers = #tpu.dot_dimension_numbers<[1], [0], [0], [1], [0, 0, 1, 1], [], []>} : vector<8x8xf32>, vector<8x8xf32>, vector<8x8xf32> -> vector<8x8xf32>
    %175 = vector.broadcast %173 : vector<8x1xf32> to vector<8x8xf32>
    %176 = arith.mulf %174, %175 : vector<8x8xf32>
    %cst_71 = arith.constant 0.000000e+00 : f32
    %177 = vector.shape_cast %27 : vector<8x1xi1> to vector<8x1xi1>
    %178 = vector.broadcast %177 : vector<8x1xi1> to vector<8x8xi1>
    %179 = vector.broadcast %cst_71 : f32 to vector<8x8xf32>
    %180 = arith.select %178, %179, %176 : vector<8x8xi1>, vector<8x8xf32>
    %c0_72 = arith.constant 0 : index
    %c16_73 = arith.constant 16 : index
    %181 = vector.load %arg26[%c0_72, %c16_73] : memref<8x32xf32, #tpu.memory_space<vmem>>, vector<8x8xf32>
    tpu.vector_store %arg26[%c0_72, %c16_73], %180 {strides = array<i32>} : memref<8x32xf32, #tpu.memory_space<vmem>>, vector<8x8xf32>,
    %182 = vector.extract_strided_slice %11 {offsets = [0, 24], sizes = [8, 8], strides = [1, 1]} : vector<8x32xf32> to vector<8x8xf32>
    %c0_74 = arith.constant 0 : index
    %c24 = arith.constant 24 : index
    %183 = vector.load %arg24[%c0_74, %c24] : memref<8x32xf32, #tpu.memory_space<vmem>>, vector<8x8xf32>
    %c0_75 = arith.constant 0 : index
    %c24_76 = arith.constant 24 : index
    %184 = vector.load %arg25[%c0_75, %c24_76] : memref<8x32xf32, #tpu.memory_space<vmem>>, vector<8x8xf32>
    %cst_77 = arith.constant dense<0.000000e+00> : vector<8x8xf32>
    %185 = tpu.matmul %182, %183, %cst_77 {dimension_numbers = #tpu.dot_dimension_numbers<[1], [1], [0], [0], [0, 0, 1, 0], [], []>} : vector<8x8xf32>, vector<8x8xf32>, vector<8x8xf32> -> vector<8x8xf32>
    %cst_78 = arith.constant -1.000000e+32 : f32
    %186 = vector.broadcast %cst_78 : f32 to vector<8x8xf32>
    %187 = arith.select %19, %185, %186 : vector<8x8xi1>, vector<8x8xf32>
    %cst_79 = arith.constant dense<0xFF800000> : vector<8xf32>
    %188 = vector.multi_reduction <maximumf>, %187, %cst_79 [1] : vector<8x8xf32> to vector<8xf32>
    %189 = vector.shape_cast %188 : vector<8xf32> to vector<8x1xf32>
    %190 = vector.broadcast %189 : vector<8x1xf32> to vector<8x8xf32>
    %191 = arith.subf %187, %190 : vector<8x8xf32>
    %192 = math.exp %191 : vector<8x8xf32>
    %cst_80 = arith.constant dense<0.000000e+00> : vector<8xf32>
    %193 = vector.multi_reduction <add>, %192, %cst_80 [1] : vector<8x8xf32> to vector<8xf32>
    %194 = vector.shape_cast %193 : vector<8xf32> to vector<8x1xf32>
    %cst_81 = arith.constant 1.000000e+00 : f32
    %195 = vector.broadcast %cst_81 : f32 to vector<8x1xf32>
    %196 = arith.divf %195, %194 : vector<8x1xf32>
    %197 = vector.broadcast %196 : vector<8x1xf32> to vector<8x8xf32>
    %198 = arith.mulf %192, %197 : vector<8x8xf32>
    %199 = arith.mulf %198, %21 : vector<8x8xf32>
    %cst_82 = arith.constant dense<0.000000e+00> : vector<8x8xf32>
    %200 = tpu.matmul %199, %28, %cst_82 {dimension_numbers = #tpu.dot_dimension_numbers<[1], [0], [0], [1], [0, 0, 1, 1], [], []>} : vector<8x8xf32>, vector<8x8xf32>, vector<8x8xf32> -> vector<8x8xf32>
    %201 = arith.mulf %200, %24 : vector<8x8xf32>
    %cst_83 = arith.constant 0.000000e+00 : f32
    %202 = vector.broadcast %cst_83 : f32 to vector<8x8xf32>
    %203 = arith.maximumf %201, %202 : vector<8x8xf32>
    %204 = math.sqrt %203 : vector<8x8xf32>
    %c3 = arith.constant 3 : index
    %205 = memref.load %arg2[%c3] : memref<4xf32, #tpu.memory_space<smem>>
    %206 = vector.broadcast %205 : f32 to vector<8x8xf32>
    %207 = arith.mulf %204, %206 : vector<8x8xf32>
    %208 = math.exp %207 : vector<8x8xf32>
    %cst_84 = arith.constant 9.99999974E-6 : f32
    %cst_85 = arith.constant 1.000000e+05 : f32
    %209 = vector.broadcast %cst_84 : f32 to vector<8x8xf32>
    %210 = arith.maximumf %209, %208 : vector<8x8xf32>
    %211 = vector.broadcast %cst_85 : f32 to vector<8x8xf32>
    %212 = arith.minimumf %211, %210 : vector<8x8xf32>
    %213 = arith.mulf %185, %212 : vector<8x8xf32>
    %cst_86 = arith.constant -1.000000e+32 : f32
    %214 = vector.broadcast %cst_86 : f32 to vector<8x8xf32>
    %215 = arith.select %19, %213, %214 : vector<8x8xi1>, vector<8x8xf32>
    %cst_87 = arith.constant dense<0xFF800000> : vector<8xf32>
    %216 = vector.multi_reduction <maximumf>, %215, %cst_87 [1] : vector<8x8xf32> to vector<8xf32>
    %217 = vector.shape_cast %216 : vector<8xf32> to vector<8x1xf32>
    %218 = vector.broadcast %217 : vector<8x1xf32> to vector<8x8xf32>
    %219 = arith.subf %215, %218 : vector<8x8xf32>
    %220 = math.exp %219 : vector<8x8xf32>
    %cst_88 = arith.constant dense<0.000000e+00> : vector<8xf32>
    %221 = vector.multi_reduction <add>, %220, %cst_88 [1] : vector<8x8xf32> to vector<8xf32>
    %222 = vector.shape_cast %221 : vector<8xf32> to vector<8x1xf32>
    %cst_89 = arith.constant 1.000000e+00 : f32
    %223 = vector.broadcast %cst_89 : f32 to vector<8x1xf32>
    %224 = arith.divf %223, %222 : vector<8x1xf32>
    %cst_90 = arith.constant dense<0.000000e+00> : vector<8x8xf32>
    %225 = tpu.matmul %220, %184, %cst_90 {dimension_numbers = #tpu.dot_dimension_numbers<[1], [0], [0], [1], [0, 0, 1, 1], [], []>} : vector<8x8xf32>, vector<8x8xf32>, vector<8x8xf32> -> vector<8x8xf32>
    %226 = vector.broadcast %224 : vector<8x1xf32> to vector<8x8xf32>
    %227 = arith.mulf %225, %226 : vector<8x8xf32>
    %cst_91 = arith.constant 0.000000e+00 : f32
    %228 = vector.shape_cast %27 : vector<8x1xi1> to vector<8x1xi1>
    %229 = vector.broadcast %228 : vector<8x1xi1> to vector<8x8xi1>
    %230 = vector.broadcast %cst_91 : f32 to vector<8x8xf32>
    %231 = arith.select %229, %230, %227 : vector<8x8xi1>, vector<8x8xf32>
    %c0_92 = arith.constant 0 : index
    %c24_93 = arith.constant 24 : index
    %232 = vector.load %arg26[%c0_92, %c24_93] : memref<8x32xf32, #tpu.memory_space<vmem>>, vector<8x8xf32>
    tpu.vector_store %arg26[%c0_92, %c24_93], %231 {strides = array<i32>} : memref<8x32xf32, #tpu.memory_space<vmem>>, vector<8x8xf32>,
    %c0_94 = arith.constant 0 : index
    %c0_95 = arith.constant 0 : index
    %233 = vector.load %arg26[%c0_94, %c0_95] : memref<8x32xf32, #tpu.memory_space<vmem>>, vector<8x32xf32>
    %c0_96 = arith.constant 0 : index
    %c0_97 = arith.constant 0 : index
    %234 = vector.load %arg13[%c0_96, %c0_97] : memref<32x32xf32, #tpu.memory_space<vmem>>, vector<32x32xf32>
    %cst_98 = arith.constant dense<0.000000e+00> : vector<8x32xf32>
    %235 = tpu.matmul %233, %234, %cst_98 {dimension_numbers = #tpu.dot_dimension_numbers<[1], [0], [0], [1], [0, 0, 1, 1], [], []>} : vector<8x32xf32>, vector<32x32xf32>, vector<8x32xf32> -> vector<8x32xf32>
    %c0_99 = arith.constant 0 : index
    %c0_100 = arith.constant 0 : index
    %236 = vector.load %arg14[%c0_99, %c0_100] : memref<1x32xf32, #tpu.memory_space<vmem>>, vector<1x32xf32>
    %237 = vector.broadcast %236 : vector<1x32xf32> to vector<8x32xf32>
    %238 = arith.addf %235, %237 : vector<8x32xf32>
    %239 = arith.addf %4, %238 : vector<8x32xf32>
    %cst_101 = arith.constant dense<0.000000e+00> : vector<8xf32>
    %240 = vector.multi_reduction <add>, %239, %cst_101 [1] : vector<8x32xf32> to vector<8xf32>
    %241 = vector.shape_cast %240 : vector<8xf32> to vector<8x1xf32>
    %cst_102 = arith.constant 3.200000e+01 : f32
    %242 = vector.broadcast %cst_102 : f32 to vector<8x1xf32>
    %243 = arith.divf %241, %242 : vector<8x1xf32>
    %244 = vector.broadcast %243 : vector<8x1xf32> to vector<8x32xf32>
    %245 = arith.subf %239, %244 : vector<8x32xf32>
    %246 = arith.mulf %245, %245 : vector<8x32xf32>
    %cst_103 = arith.constant dense<0.000000e+00> : vector<8xf32>
    %247 = vector.multi_reduction <add>, %246, %cst_103 [1] : vector<8x32xf32> to vector<8xf32>
    %248 = vector.shape_cast %247 : vector<8xf32> to vector<8x1xf32>
    %cst_104 = arith.constant 3.200000e+01 : f32
    %249 = vector.broadcast %cst_104 : f32 to vector<8x1xf32>
    %250 = arith.divf %248, %249 : vector<8x1xf32>
    %cst_105 = arith.constant 9.99999974E-6 : f32
    %251 = vector.broadcast %cst_105 : f32 to vector<8x1xf32>
    %252 = arith.addf %250, %251 : vector<8x1xf32>
    %253 = math.rsqrt %252 : vector<8x1xf32>
    %254 = vector.broadcast %253 : vector<8x1xf32> to vector<8x32xf32>
    %255 = arith.mulf %245, %254 : vector<8x32xf32>
    %c0_106 = arith.constant 0 : index
    %c0_107 = arith.constant 0 : index
    %256 = vector.load %arg15[%c0_106, %c0_107] : memref<1x32xf32, #tpu.memory_space<vmem>>, vector<1x32xf32>
    %257 = vector.broadcast %256 : vector<1x32xf32> to vector<8x32xf32>
    %258 = arith.mulf %255, %257 : vector<8x32xf32>
    %c0_108 = arith.constant 0 : index
    %c0_109 = arith.constant 0 : index
    %259 = vector.load %arg16[%c0_108, %c0_109] : memref<1x32xf32, #tpu.memory_space<vmem>>, vector<1x32xf32>
    %260 = vector.broadcast %259 : vector<1x32xf32> to vector<8x32xf32>
    %261 = arith.addf %258, %260 : vector<8x32xf32>
    %c0_110 = arith.constant 0 : index
    %c0_111 = arith.constant 0 : index
    %262 = vector.load %arg17[%c0_110, %c0_111] : memref<32x64xf32, #tpu.memory_space<vmem>>, vector<32x64xf32>
    %cst_112 = arith.constant dense<0.000000e+00> : vector<8x64xf32>
    %263 = tpu.matmul %261, %262, %cst_112 {dimension_numbers = #tpu.dot_dimension_numbers<[1], [0], [0], [1], [0, 0, 1, 1], [], []>} : vector<8x32xf32>, vector<32x64xf32>, vector<8x64xf32> -> vector<8x64xf32>
    %c0_113 = arith.constant 0 : index
    %c0_114 = arith.constant 0 : index
    %264 = vector.load %arg18[%c0_113, %c0_114] : memref<1x64xf32, #tpu.memory_space<vmem>>, vector<1x64xf32>
    %265 = vector.broadcast %264 : vector<1x64xf32> to vector<8x64xf32>
    %266 = arith.addf %263, %265 : vector<8x64xf32>
    %cst_115 = arith.constant 0.000000e+00 : f32
    %267 = vector.broadcast %cst_115 : f32 to vector<8x64xf32>
    %268 = arith.maximumf %266, %267 : vector<8x64xf32>
    %c0_116 = arith.constant 0 : index
    %c0_117 = arith.constant 0 : index
    %269 = vector.load %arg19[%c0_116, %c0_117] : memref<64x32xf32, #tpu.memory_space<vmem>>, vector<64x32xf32>
    %cst_118 = arith.constant dense<0.000000e+00> : vector<8x32xf32>
    %270 = tpu.matmul %268, %269, %cst_118 {dimension_numbers = #tpu.dot_dimension_numbers<[1], [0], [0], [1], [0, 0, 1, 1], [], []>} : vector<8x64xf32>, vector<64x32xf32>, vector<8x32xf32> -> vector<8x32xf32>
    %c0_119 = arith.constant 0 : index
    %c0_120 = arith.constant 0 : index
    %271 = vector.load %arg20[%c0_119, %c0_120] : memref<1x32xf32, #tpu.memory_space<vmem>>, vector<1x32xf32>
    %272 = vector.broadcast %271 : vector<1x32xf32> to vector<8x32xf32>
    %273 = arith.addf %270, %272 : vector<8x32xf32>
    %274 = arith.addf %261, %273 : vector<8x32xf32>
    %cst_121 = arith.constant dense<0.000000e+00> : vector<8xf32>
    %275 = vector.multi_reduction <add>, %274, %cst_121 [1] : vector<8x32xf32> to vector<8xf32>
    %276 = vector.shape_cast %275 : vector<8xf32> to vector<8x1xf32>
    %cst_122 = arith.constant 3.200000e+01 : f32
    %277 = vector.broadcast %cst_122 : f32 to vector<8x1xf32>
    %278 = arith.divf %276, %277 : vector<8x1xf32>
    %279 = vector.broadcast %278 : vector<8x1xf32> to vector<8x32xf32>
    %280 = arith.subf %274, %279 : vector<8x32xf32>
    %281 = arith.mulf %280, %280 : vector<8x32xf32>
    %cst_123 = arith.constant dense<0.000000e+00> : vector<8xf32>
    %282 = vector.multi_reduction <add>, %281, %cst_123 [1] : vector<8x32xf32> to vector<8xf32>
    %283 = vector.shape_cast %282 : vector<8xf32> to vector<8x1xf32>
    %cst_124 = arith.constant 3.200000e+01 : f32
    %284 = vector.broadcast %cst_124 : f32 to vector<8x1xf32>
    %285 = arith.divf %283, %284 : vector<8x1xf32>
    %cst_125 = arith.constant 9.99999974E-6 : f32
    %286 = vector.broadcast %cst_125 : f32 to vector<8x1xf32>
    %287 = arith.addf %285, %286 : vector<8x1xf32>
    %288 = math.rsqrt %287 : vector<8x1xf32>
    %289 = vector.broadcast %288 : vector<8x1xf32> to vector<8x32xf32>
    %290 = arith.mulf %280, %289 : vector<8x32xf32>
    %c0_126 = arith.constant 0 : index
    %c0_127 = arith.constant 0 : index
    %291 = vector.load %arg21[%c0_126, %c0_127] : memref<1x32xf32, #tpu.memory_space<vmem>>, vector<1x32xf32>
    %292 = vector.broadcast %291 : vector<1x32xf32> to vector<8x32xf32>
    %293 = arith.mulf %290, %292 : vector<8x32xf32>
    %c0_128 = arith.constant 0 : index
    %c0_129 = arith.constant 0 : index
    %294 = vector.load %arg22[%c0_128, %c0_129] : memref<1x32xf32, #tpu.memory_space<vmem>>, vector<1x32xf32>
    %295 = vector.broadcast %294 : vector<1x32xf32> to vector<8x32xf32>
    %296 = arith.addf %293, %295 : vector<8x32xf32>
    %c0_130 = arith.constant 0 : index
    %c0_131 = arith.constant 0 : index
    %c0_132 = arith.constant 0 : index
    %297 = vector.load %arg23[%c0_130, %c0_131, %c0_132] : memref<1x8x32xf32, #tpu.memory_space<vmem>>, vector<1x8x32xf32>
    %298 = vector.shape_cast %297 : vector<1x8x32xf32> to vector<8x32xf32>
    %299 = vector.shape_cast %296 : vector<8x32xf32> to vector<1x8x32xf32>
    tpu.vector_store %arg23[%c0_130, %c0_131, %c0_132], %299 {strides = array<i32>} : memref<1x8x32xf32, #tpu.memory_space<vmem>>, vector<1x8x32xf32>,
    return
  }
  func.func @transform_0(%arg0: i32, %arg1: i32) -> i32 {
    %c0_i32 = arith.constant 0 : i32
    %c0_i32_0 = arith.constant 0 : i32
    return %c0_i32 : i32
  }
  func.func @transform_1(%arg0: i32, %arg1: i32) -> (i32, i32, i32) {
    %c0_i32 = arith.constant 0 : i32
    %c0_i32_0 = arith.constant 0 : i32
    return %arg0, %arg1, %c0_i32 : i32, i32, i32
  }
  func.func @transform_2(%arg0: i32, %arg1: i32) -> (i32, i32, i32) {
    %c0_i32 = arith.constant 0 : i32
    %c0_i32_0 = arith.constant 0 : i32
    %c0_i32_1 = arith.constant 0 : i32
    return %arg0, %c0_i32, %c0_i32_0 : i32, i32, i32
  }
  func.func @transform_3(%arg0: i32, %arg1: i32) -> (i32, i32, i32) {
    %c0_i32 = arith.constant 0 : i32
    %c0_i32_0 = arith.constant 0 : i32
    %c0_i32_1 = arith.constant 0 : i32
    return %arg0, %c0_i32, %c0_i32_0 : i32, i32, i32
  }
  func.func @transform_4(%arg0: i32, %arg1: i32) -> (i32, i32) {
    %c0_i32 = arith.constant 0 : i32
    %c0_i32_0 = arith.constant 0 : i32
    %c0_i32_1 = arith.constant 0 : i32
    return %c0_i32, %c0_i32_0 : i32, i32
  }
  func.func @transform_5(%arg0: i32, %arg1: i32) -> (i32, i32) {
    %c0_i32 = arith.constant 0 : i32
    %c0_i32_0 = arith.constant 0 : i32
    %c0_i32_1 = arith.constant 0 : i32
    return %c0_i32, %c0_i32_0 : i32, i32
  }
  func.func @transform_6(%arg0: i32, %arg1: i32) -> (i32, i32) {
    %c0_i32 = arith.constant 0 : i32
    %c0_i32_0 = arith.constant 0 : i32
    %c0_i32_1 = arith.constant 0 : i32
    return %c0_i32, %c0_i32_0 : i32, i32
  }
  func.func @transform_7(%arg0: i32, %arg1: i32) -> (i32, i32) {
    %c0_i32 = arith.constant 0 : i32
    %c0_i32_0 = arith.constant 0 : i32
    %c0_i32_1 = arith.constant 0 : i32
    return %c0_i32, %c0_i32_0 : i32, i32
  }
  func.func @transform_8(%arg0: i32, %arg1: i32) -> (i32, i32) {
    %c0_i32 = arith.constant 0 : i32
    %c0_i32_0 = arith.constant 0 : i32
    %c0_i32_1 = arith.constant 0 : i32
    return %c0_i32, %c0_i32_0 : i32, i32
  }
  func.func @transform_9(%arg0: i32, %arg1: i32) -> (i32, i32) {
    %c0_i32 = arith.constant 0 : i32
    %c0_i32_0 = arith.constant 0 : i32
    %c0_i32_1 = arith.constant 0 : i32
    return %c0_i32, %c0_i32_0 : i32, i32
  }
  func.func @transform_10(%arg0: i32, %arg1: i32) -> (i32, i32) {
    %c0_i32 = arith.constant 0 : i32
    %c0_i32_0 = arith.constant 0 : i32
    %c0_i32_1 = arith.constant 0 : i32
    return %c0_i32, %c0_i32_0 : i32, i32
  }
  func.func @transform_11(%arg0: i32, %arg1: i32) -> (i32, i32) {
    %c0_i32 = arith.constant 0 : i32
    %c0_i32_0 = arith.constant 0 : i32
    %c0_i32_1 = arith.constant 0 : i32
    return %c0_i32, %c0_i32_0 : i32, i32
  }
  func.func @transform_12(%arg0: i32, %arg1: i32) -> (i32, i32) {
    %c0_i32 = arith.constant 0 : i32
    %c0_i32_0 = arith.constant 0 : i32
    %c0_i32_1 = arith.constant 0 : i32
    return %c0_i32, %c0_i32_0 : i32, i32
  }
  func.func @transform_13(%arg0: i32, %arg1: i32) -> (i32, i32) {
    %c0_i32 = arith.constant 0 : i32
    %c0_i32_0 = arith.constant 0 : i32
    %c0_i32_1 = arith.constant 0 : i32
    return %c0_i32, %c0_i32_0 : i32, i32
  }
  func.func @transform_14(%arg0: i32, %arg1: i32) -> (i32, i32) {
    %c0_i32 = arith.constant 0 : i32
    %c0_i32_0 = arith.constant 0 : i32
    %c0_i32_1 = arith.constant 0 : i32
    return %c0_i32, %c0_i32_0 : i32, i32
  }
  func.func @transform_15(%arg0: i32, %arg1: i32) -> (i32, i32) {
    %c0_i32 = arith.constant 0 : i32
    %c0_i32_0 = arith.constant 0 : i32
    %c0_i32_1 = arith.constant 0 : i32
    return %c0_i32, %c0_i32_0 : i32, i32
  }
  func.func @transform_16(%arg0: i32, %arg1: i32) -> (i32, i32) {
    %c0_i32 = arith.constant 0 : i32
    %c0_i32_0 = arith.constant 0 : i32
    %c0_i32_1 = arith.constant 0 : i32
    return %c0_i32, %c0_i32_0 : i32, i32
  }
  func.func @transform_17(%arg0: i32, %arg1: i32) -> (i32, i32) {
    %c0_i32 = arith.constant 0 : i32
    %c0_i32_0 = arith.constant 0 : i32
    %c0_i32_1 = arith.constant 0 : i32
    return %c0_i32, %c0_i32_0 : i32, i32
  }
  func.func @transform_18(%arg0: i32, %arg1: i32) -> (i32, i32) {
    %c0_i32 = arith.constant 0 : i32
    %c0_i32_0 = arith.constant 0 : i32
    %c0_i32_1 = arith.constant 0 : i32
    return %c0_i32, %c0_i32_0 : i32, i32
  }
  func.func @transform_19(%arg0: i32, %arg1: i32) -> (i32, i32) {
    %c0_i32 = arith.constant 0 : i32
    %c0_i32_0 = arith.constant 0 : i32
    %c0_i32_1 = arith.constant 0 : i32
    return %c0_i32, %c0_i32_0 : i32, i32
  }
  func.func @transform_20(%arg0: i32, %arg1: i32) -> (i32, i32) {
    %c0_i32 = arith.constant 0 : i32
    %c0_i32_0 = arith.constant 0 : i32
    %c0_i32_1 = arith.constant 0 : i32
    return %c0_i32, %c0_i32_0 : i32, i32
  }
  func.func @transform_21(%arg0: i32, %arg1: i32) -> (i32, i32, i32) {
    %c0_i32 = arith.constant 0 : i32
    %c0_i32_0 = arith.constant 0 : i32
    return %arg0, %arg1, %c0_i32 : i32, i32, i32
  }
}

</mosaic_0001>

<bundles_post_ra>
// kernel: tpu_custom_call.1
= control target key start
LH: loop header
LB: loop body
LE: loop exit
PB: predicated region body
PF: predicated region fallthrough
CT: control target
= control target key end

     0   :  { %s3157_s0 = inlined_call_operand.hbm [shape: f32[4], index: 0, kind: input, shape index: {}]   ;;  %s3158_s1 = inlined_call_operand.hbm [shape: f32[2,8,32], index: 1, kind: input, shape index: {}]   ;;  %s3159_s2 = inlined_call_operand.hbm [shape: f32[2,8,32], index: 2, kind: input, shape index: {}]   ;;  %s3160_s3 = inlined_call_operand.hbm [shape: f32[2,8,32], index: 3, kind: input, shape index: {}]   ;;  %s3161_s4 = inlined_call_operand.vmem [shape: f32[32,32], index: 4, kind: input, shape index: {}]   ;;  %s3162_s5 = inlined_call_operand.vmem [shape: f32[1,32], index: 5, kind: input, shape index: {}]   ;;  %s3163_s6 = inlined_call_operand.vmem [shape: f32[32,32], index: 6, kind: input, shape index: {}]   ;;  %s3164_s7 = inlined_call_operand.hbm [shape: f32[1,32], index: 7, kind: input, shape index: {}]   ;;  %s3165_s8 = inlined_call_operand.vmem [shape: f32[32,32], index: 8, kind: input, shape index: {}]   ;;  %s3166_s9 = inlined_call_operand.hbm [shape: f32[1,32], index: 9, kind: input, shape index: {}]   ;;  %s3167_s10 = inlined_call_operand.vmem [shape: f32[8,8], index: 10, kind: input, shape index: {}]   ;;  %s3168_s11 = inlined_call_operand.hbm [shape: f32[32,32], index: 11, kind: input, shape index: {}]   ;;  %s3169_s12 = inlined_call_operand.vmem [shape: f32[1,32], index: 12, kind: input, shape index: {}]   ;;  %s3170_s13 = inlined_call_operand.vmem [shape: f32[1,32], index: 13, kind: input, shape index: {}]   ;;  %s3171_s14 = inlined_call_operand.vmem [shape: f32[1,32], index: 14, kind: input, shape index: {}]   ;;  %s3172_s15 = inlined_call_operand.hbm [shape: f32[32,64], index: 15, kind: input, shape index: {}]   ;;  %s3173_s16 = inlined_call_operand.vmem [shape: f32[1,64], index: 16, kind: input, shape index: {}]   ;;  %s3174_s17 = inlined_call_operand.vmem [shape: f32[64,32], index: 17, kind: input, shape index: {}]   ;;  %s3175_s18 = inlined_call_operand.vmem [shape: f32[1,32], index: 18, kind: input, shape index: {}]   ;;  %s3176_s19 = inlined_call_operand.vmem [shape: f32[1,32], index: 19, kind: input, shape index: {}]   ;;  %s3177_s20 = inlined_call_operand.vmem [shape: f32[1,32], index: 20, kind: input, shape index: {}]   ;;  %s3178_s21 = inlined_call_operand.hbm [shape: f32[2,8,32], index: 21, kind: output, shape index: {}]  }
   0x1   :  { %3193 = sst [smem:[#allocation34_spill]] %s3157_s0 }
   0x2   :  { %3194 = sst [smem:[#allocation35_spill]] %s3158_s1 }
   0x3   :  { %3195 = sst [smem:[#allocation36_spill]] %s3159_s2 }
   0x4   :  { %3196 = sst [smem:[#allocation37_spill]] %s3160_s3 }
   0x5   :  { %3197 = sst [smem:[#allocation38_spill]] %s3161_s4 }
   0x6   :  { %3198 = sst [smem:[#allocation39_spill]] %s3162_s5 }
   0x7   :  { %3199 = sst [smem:[#allocation40_spill]] %s3164_s7 }
   0x8   :  { %3200 = sst [smem:[#allocation41_spill]] %s3166_s9 }
   0x9   :  { %3201 = sst [smem:[#allocation42_spill]] %s3168_s11 }
   0xa   :  { %3202 = sst [smem:[#allocation43_spill]] %s3169_s12 }
   0xb   :  { %3203 = sst [smem:[#allocation44_spill]] %s3170_s13 }
   0xc   :  { %3204 = sst [smem:[#allocation45_spill]] %s3171_s14 }
   0xd   :  { %3205 = sst [smem:[#allocation46_spill]] %s3172_s15 }
   0xe   :  { %3206 = sst [smem:[#allocation47_spill]] %s3173_s16 }
   0xf   :  { %3207 = sst [smem:[#allocation48_spill]] %s3174_s17 }
  0x10   :  { %3208 = sst [smem:[#allocation49_spill]] %s3175_s18 }
  0x11   :  { %3209 = sst [smem:[#allocation50_spill]] %s3176_s19 }
  0x12   :  { %3210 = sst [smem:[#allocation51_spill]] %s3177_s20 }
  0x13   :  { %3211 = sst [smem:[#allocation52_spill]] %s3178_s21 }
  0x14   :  { %26 = vsyncpa [#allocation8], 0 }
  0x15   :  { %27 = vsyncpa [#allocation6], 0 }
  0x16   :  { %29 = vsyncpa [#allocation6 + $0x1], 0 }
  0x17   :  { %30 = vsyncpa [#allocation11], 0 }
  0x18   :  { %32 = vsyncpa [#allocation11 + $0x1], 0 }
  0x19   :  { %33 = vsyncpa [#allocation14], 0 }
  0x1a   :  { %34 = vsyncpa [#allocation17], 0 }
  0x1b   :  { %35 = vsyncpa [#allocation7], 0 }
  0x1c   :  { %37 = vsyncpa [#allocation7 + $0x1], 0  ;;  %s2672_s2 = smov 0   ;;  %s2674_s25 = smov 0  }
  0x1d   :  { %s2676_s26 = smov 0   ;;  %s2678_s27 = smov 0  }
  0x1e   :  { %s2680_s3 = smov 0   ;;  %s2682_s28 = smov 0  }
  0x1f LB: > { %3212 = sst [smem:[#allocation26_spill]] %s2525_s2  ;;  %s2706_s30 = sadd.s32 4294967295, %s2545_s28   ;;  %s2545_s28 = sphi %s2682_s28, %s43_s28   ;;  %s2541_s3 = sphi %s2680_s3, %s3257_s3   ;;  %s2537_s27 = sphi %s2678_s27, %s3256_s27   ;;  %s2533_s26 = sphi %s2676_s26, %s3260_s26   ;;  %s2529_s25 = sphi %s2674_s25, %s3259_s25   ;;  %s2525_s2 = sphi %s2672_s2, %s3258_s2  }
  0x20   : > { %3213 = sst [smem:[#allocation27_spill]] %s2537_s27  ;;  %p1972_p0 = scmp.ge.s32.totalorder %s2545_s28, 1 }
  0x21   : > { %3214 = sst [smem:[#allocation28_spill]] %s2541_s3  ;;  %p99_p1 = scmp.eq.s32.totalorder %s2706_s30, 0 }
  0x22   : > { %3215 = sst [smem:[#allocation29_spill]] %s2545_s28  ;;  %p546_p2 = scmp.lt.s32.totalorder %s2545_s28, 3 }
  0x23   : > { %s3216_s7 = sld [smem:[#allocation40_spill]]  ;;  %s2547_s22 = smov [#allocation13]  }
  0x24   : > { %p2711_p3 = pnand %p1972_p0, %p546_p2  ;;  %s579_s23 = sshll.u32 %s2547_s22, 4  ;;  %s580_s23 = int_to_ptr.vmem [resolvable:$true] %s579_s23 }
  0x25   : > { %p1978_p4 = scmp.ge.s32.totalorder %s2545_s28, 2  ;;  %s3218_s11 = sld [smem:[#allocation42_spill]] }
  0x26   : > { %p2053_p5 = pneg %p2711_p3  ;;  %s2548_s22 = smov [#allocation16]  }
  0x27   : > { %s3181_s1 = smov 128   ;;  %s3182_s24 = smov 8  }
  0x28   : > { %p2723_p6 = pnand %p2053_p5, %p99_p1  ;;  %s55_s20 = sadd.s32 1, %s2541_s3 }
  0x29   : > { %s577_s4 = sshll.u32 %s3216_s7, 4  ;;  %s608_s7 = sshll.u32 %s2548_s22, 4  ;;  %s578_s4 = int_to_ptr.hbm [resolvable:$true] %s577_s4  ;;  %s609_s7 = int_to_ptr.vmem [resolvable:$true] %s608_s7 }
  0x2a   : > { %2059 = dma.hbm_to_vmem [thread:$0]  (!%p2723_p6), %s578_s4, 16, %s580_s23, [#allocation14]  }
  0x2b   : > { %s606_s29 = sshll.u32 %s3218_s11, 4  ;;  %s1971_s11 = sadd.s32 4294967294, %s2545_s28   ;;  %s607_s29 = int_to_ptr.hbm [resolvable:$true] %s606_s29 }
  0x2c   : > { %2065 = dma.hbm_to_vmem [thread:$0]  (!%p2723_p6), %s607_s29, 512, %s609_s7, [#allocation17], %s3181_s1, %s3181_s1, %s3182_s24  }
  0x2d   : > { %p57_p7 = scmp.ge.s32.totalorder %s55_s20, 2  ;;  %s85_s21 = sadd.s32 1, %s2533_s26 }
  0x2e   : > { %p92_p8 = scmp.ne.s32.totalorder %s2533_s26, %s2529_s25  ;;  %p93_p9 = scmp.eq.s32.totalorder %s2545_s28, 0 }
  0x2f   : > { %s3262_s20 = smov (%p57_p7, %s55_s20), 0  ;;  %p98_p11 = scmp.ne.s32.totalorder %s2529_s25, %s2525_s2 }
  0x30   : > { %3220 = sst [smem:[#allocation30_spill]] %s3262_s20  ;;  %p2742_p10 = por %p93_p9, %p92_p8 }
  0x31   : > { %s80_s7 = ssub.s32 %s2541_s3, %s3262_s20  ;;  %p533_p12 = scmp.eq.s32.totalorder %s2706_s30, 1 }
  0x32   : > { %p83_p13 = scmp.eq.s32.totalorder %s80_s7, 0  ;;  %p2753_p0 = por %p99_p1, %p98_p11 }
  0x33   : > { %p2757_p2 = por %p533_p12, %p92_p8  ;;  %p539_p5 = scmp.eq.s32.totalorder %s1971_s11, 1 }
  0x34   : > { %s2762_s22 = scalar_select %p83_p13, %s2533_s26, %s85_s21  }
  0x35   : > { %s3223_s29 = scalar_select %p2757_p2, 1, 0 }
  0x36   : > { %3225 = sst [smem:[#allocation32_spill]] %s2762_s22  ;;  %p2764_p7 = por %p539_p5, %p98_p11 }
  0x37   : > { %3224 = sst [smem:[#allocation31_spill]] %s3223_s29  ;;  %p2088_p9 = scmp.lt.s32.totalorder %s2545_s28, 2 }
  0x38   : > { %s3226_s1 = scalar_select %p2764_p7, 1, 0 }
  0x39   : > { %s3189_s24 = sand.u32 1, %s2533_s26   ;;  %s2771_s7 = sshll.u32 %s2541_s3, 3 }
  0x3a   : > { %3227 = sst [smem:[#allocation33_spill]] %s3226_s1  ;;  %s2775_s20 = sshll.u32 %s3189_s24, 3 }
  0x3b   : > { %p2779_p8 = pnand %p2088_p9, %p2742_p10  ;;  %s680_s11 = sand.u32 1, %s2545_s28  }
  0x3c   : > { %s3229_s1 = sld [smem:[#allocation36_spill]]  ;;  %s684_s19 = scalar_lea.vmem [#allocation10], %s2775_s20 }
  0x3d   : > { %s692_s27 = sshll.u32 %s684_s19, 4  ;;  %s2789_s24 = scalar_lea.sflag [#allocation11], %s680_s11  ;;  %s693_s27 = int_to_ptr.vmem [resolvable:$true] %s692_s27 }
  0x3e   : > { %s3230_s16 = sld [smem:[#allocation34_spill]]  ;;  %s2552_s11 = smov [#allocation15]  }
  0x3f   : > { %s3231_s9 = sld [smem:[#allocation41_spill]]  ;;  %s594_s21 = sshll.u32 %s2552_s11, 4  ;;  %s595_s21 = int_to_ptr.vmem [resolvable:$true] %s594_s21 }
  0x40   : > { %s3232_s15 = sld [smem:[#allocation46_spill]]  ;;  %s3233_s4 = smov 8  }
  0x41   : > { %s3235_s11 = sld [smem:[#allocation35_spill]]  ;;  %s664_s18 = scalar_lea.vmem [#allocation9], %s2775_s20 }
  0x42   : > { %s688_s29 = scalar_lea.hbm %s3229_s1, %s2771_s7  ;;  %s2551_s1 = smov [#allocation5]  }
  0x43   : > { %s690_s3 = sshll.u32 %s688_s29, 4  ;;  %s3237_s14 = sld [smem:[#allocation37_spill]]  ;;  %s691_s3 = int_to_ptr.hbm [resolvable:$true] %s690_s3 }
  0x44   : > { %2075 = dma.hbm_to_vmem [thread:$0]  (!%p2779_p8), %s691_s3, 128, %s693_s27, %s2789_s24  }
  0x45   : > { %s558_s28 = sshll.u32 %s3230_s16, 4  ;;  %s592_s22 = sshll.u32 %s3231_s9, 4  ;;  %s559_s28 = int_to_ptr.hbm [resolvable:$true] %s558_s28  ;;  %s593_s22 = int_to_ptr.hbm [resolvable:$true] %s592_s22 }
  0x46   : > { %2056 = dma.hbm_to_smem (!%p2723_p6), %s559_s28, 16, %s2551_s1, [#allocation8]  }
  0x47   : > { %s629_s16 = sshll.u32 %s3232_s15, 4  ;;  %s2553_s3 = smov [#allocation18]   ;;  %s630_s16 = int_to_ptr.hbm [resolvable:$true] %s629_s16 }
  0x48   : > { %2062 = dma.hbm_to_vmem [thread:$0]  (!%p2723_p6), %s593_s22, 16, %s595_s21, [#allocation14]  }
  0x49   : > { %s631_s28 = sshll.u32 %s2553_s3, 4  ;;  %s3234_s1 = smov 128   ;;  %s632_s28 = int_to_ptr.vmem [resolvable:$true] %s631_s28 }
  0x4a   : > { %2068 = dma.hbm_to_vmem [thread:$0]  (!%p2723_p6), %s630_s16, 512, %s632_s28, [#allocation17], %s3234_s1, %s3234_s1, %s3233_s4  }
  0x4b   : > { %s669_s27 = scalar_lea.hbm %s3235_s11, %s2771_s7  ;;  %s673_s9 = sshll.u32 %s664_s18, 4  ;;  %s674_s9 = int_to_ptr.vmem [resolvable:$true] %s673_s9 }
  0x4c   : > { %s671_s15 = sshll.u32 %s669_s27, 4  ;;  %s3236_s22 = sand.u32 1, %s2533_s26   ;;  %s672_s15 = int_to_ptr.hbm [resolvable:$true] %s671_s15 }
  0x4d   : > { %s661_s21 = scalar_lea.sflag [#allocation6], %s3236_s22  ;;  %s707_s13 = scalar_lea.hbm %s3237_s14, %s2771_s7 }
  0x4e   : > { %2072 = dma.hbm_to_vmem [thread:$0]  (!%p2779_p8), %s672_s15, 128, %s674_s9, %s661_s21  }
  0x4f   : > { %s703_s17 = scalar_lea.vmem [#allocation12], %s2775_s20  ;;  %s709_s16 = sshll.u32 %s707_s13, 4  ;;  %s710_s16 = int_to_ptr.hbm [resolvable:$true] %s709_s16 }
  0x50   : > { %s711_s12 = sshll.u32 %s703_s17, 4  ;;  %720 = sbr.rel (%p2711_p3) target bundleno = 2983 (0xba7), region = 104  ;;  %s712_s12 = int_to_ptr.vmem [resolvable:$true] %s711_s12 }
  0x51   : > { %2078 = dma.hbm_to_vmem [thread:$0]  (!%p2779_p8), %s710_s16, 128, %s712_s12, %s2789_s24  }
  0x55   : > { %2500 = dma.done.wait (%p99_p1), [#allocation8], 16  }
  0x56   : > { %2502 = vsyncadd (%p99_p1), [#allocation8], 4294967280  ;;  %s2836_s9 = sand.u32 1, %s2529_s25  }
  0x57   : > { %s2839_s13 = sshll.u32 %s2836_s9, 3  ;;  %s728_s14 = scalar_lea.sflag [#allocation6], %s2836_s9 }
  0x58   : > { %s731_s12 = scalar_lea.vmem [#allocation9], %s2839_s13 }
  0x59   : > { %2504 = dma.done.wait (%p2753_p0), %s728_s14, 128  }
  0x5a   : > { %2506 = vsyncadd (%p2753_p0), %s728_s14, 4294967168  ;;  %s737_s15 = sand.u32 1, %s2706_s30   ;;  %s741_s20 = scalar_lea.vmem [#allocation10], %s2839_s13 }
  0x5b   : > { %s738_s17 = scalar_lea.sflag [#allocation11], %s737_s15 }
  0x5c   : > { %2508 = dma.done.wait (%p2753_p0), %s738_s17, 256  }
  0x5d   : > { %2510 = vsyncadd (%p2753_p0), %s738_s17, 4294967040  ;;  %s751_s2 = scalar_lea.vmem [#allocation12], %s2839_s13 }
  0x5e   : > { %2512 = dma.done.wait (%p99_p1), [#allocation14], 32  }
  0x5f   : > { %2514 = vsyncadd (%p99_p1), [#allocation14], 4294967264 }
  0x60   : > { %2516 = dma.done.wait (%p99_p1), [#allocation17], 1024  }
  0x61   : > { %2518 = vsyncadd (%p99_p1), [#allocation17], 4294966272 }
  0x62   : > { %777 = sfence }
  0x63   : > { %v850_v0 = vld [vmem:[%s3163_s6 + $0x18] sm:$0xff]  ;;  %v849_v1 = vld [vmem:[%s3163_s6 + $0x10] sm:$0xff]  ;;  %s3238_s1 = sld [smem:[#allocation38_spill]]  ;;  %v848_v4 = vld [vmem:[%s3163_s6 + $0x8] sm:$0xff]  ;;  %vm855_vm0 = vcmask 261120   ;;  %vm965_vm1 = vcmask 64512   ;;  %v947_v24 = vlaneseq }
  0x64   : > { %871 = vmatpush.msra.mxu1 %v850_v0  ;;  %v847_v5 = vld [vmem:[%s3163_s6] sm:$0xff]  ;;  %v846_v7 = vld [vmem:[%s741_s20] sm:$0xff]  ;;  %v884_v10 = vld [vmem:[%s3165_s8 + $0x18] sm:$0xff]  ;;  %s3239_s28 = sld [smem:[#allocation39_spill]]  ;;  %s2554_s4 = smov 120   ;;  %v2556_v61 = vmov 0.0  }
  0x65   : > { %v2886_v9 = vld [vmem:[%s731_s12] sm:$0xff]  ;;  %v883_v11 = vld [vmem:[%s3165_s8 + $0x10] sm:$0xff]  ;;  %v882_v12 = vld [vmem:[%s3165_s8 + $0x8] sm:$0xff]  ;;  %v2924_v26 = vshrl.u32 %v947_v24, 7  ;;  %v953_v27 = vand.u32 127, %v947_v24  ;;  %s2557_s30 = smov 104  }
  0x66   : > { %872 = vmatpush.msra.mxu1 %v849_v1  ;;  %v881_v13 = vld [vmem:[%s3165_s8] sm:$0xff]  ;;  %v2158_v14 = vld [vmem:[#allocation13] ss:$0 sm:$0xff]  ;;  %v2160_v32 = vld [vmem:[#allocation15] ss:$0 sm:$0xff]  ;;  %s1056_s11 = sld [smem:[#allocation5]] }
  0x67   : > { %v880_v22 = vld [vmem:[%s751_s2] sm:$0xff]  ;;  %v2927_v28 = vsub.s32 %v953_v27, %v2924_v26  ;;  %s2555_s2 = smov 112   ;;  %s2006_s27 = sld [smem:[#allocation5 + $0x1]] }
  0x68   : > { %873 = vmatpush.msra.mxu1 %v848_v4  ;;  %v2952_v44 = vld [vmem:[%s3167_s10] sm:$0xff]  ;;  %s2558_s18 = smov 8   ;;  %s2011_s22 = sld [smem:[#allocation5 + $0x2]] }
  0x69   : > { %v917_v2 = vld [vmem:[%s3238_s1 + $0x18] sm:$0xff]  ;;  %v916_v3 = vld [vmem:[%s3238_s1 + $0x10] sm:$0xff]  ;;  %v915_v6 = vld [vmem:[%s3238_s1 + $0x8] sm:$0xff]  ;;  %vm955_vm2 = vcmp.lt.s32.totalorder %v2927_v28, 0  ;;  %s2016_s21 = sld [smem:[#allocation5 + $0x3]]  ;;  %s2559_s0 = smov 24  }
  0x6a   : > { %938 = vmatpush.msra.mxu2 %v917_v2  ;;  %v914_v8 = vld [vmem:[%s3238_s1] sm:$0xff]  ;;  %874 = vmatpush.msra.mxu1 %v847_v5  ;;  %v2961_v62 = vsel %vm955_vm2, 1.0, %v2556_v61  ;;  %s2560_s3 = smov 16   ;;  %s3240_s15 = sld [smem:[#allocation43_spill]] }
  0x6b   : > { %1995 = vmatmul.msk.f32.vlgmr.msra.gmra.mxu1 %vm855_vm0, %v846_v7  ;;  %v2159_v17 = vld [vmem:[%s3239_s28] ss:$0 sm:$0xff]  ;;  %s3241_s20 = sld [smem:[#allocation48_spill]]  ;;  %s841_s14 = scalar_lea.vmem [#allocation19], %s2839_s13 }
  0x6c   : > { %939 = vmatpush.msra.mxu2 %v916_v3  ;;  %904 = vmatpush.msrb.mxu1 %v884_v10  ;;  %s3244_s5 = sld [smem:[#allocation47_spill]]  ;;  %s1781_s12 = scalar_lea.sflag [#allocation7], %s2836_s9 }
  0x6d   : > { %s3245_s7 = sld [smem:[#allocation49_spill]] }
  0x6e   : > { %940 = vmatpush.msra.mxu2 %v915_v6  ;;  %905 = vmatpush.msrb.mxu1 %v883_v11  ;;  %s3246_s28 = sld [smem:[#allocation27_spill]] }
  0x6f   : > { %s3247_s29 = sld [smem:[#allocation50_spill]] }
  0x70   : > { %941 = vmatpush.msra.mxu2 %v914_v8  ;;  %906 = vmatpush.msrb.mxu1 %v882_v12  ;;  %s3251_s16 = sld [smem:[#allocation51_spill]] }
  0x71   : > { %1997 = vmatmul.msk.f32.vlgmr.msra.gmra.mxu2 %vm855_vm0, %v2886_v9 }
  0x72   : > { %907 = vmatpush.msrb.mxu1 %v881_v13  ;;  %1193 = vmatpush.msrb.mxu2 %v2952_v44 }
  0x73   : > { %1996 = vmatmul.msk.f32.vlgmr.msrb.gmra.mxu1 %vm855_vm0, %v880_v22 }
  0xe8   : > { %v876_v15 = vpop.f32.mrf.mxu1 }
  0xe9   : > { %v877_v16 = vadd.f32 %v2158_v14, %v876_v15 }
  0xeb   : > { %879 = vst.msk [vmem:[#allocation2] sm:$0xff] %vm855_vm0, %v877_v16 }
  0xf0   : > { %v909_v33 = vpop.f32.mrf.mxu1 }
  0xf1   : > { %v910_v34 = vadd.f32 %v2160_v32, %v909_v33 }
  0xf2   : > { %v2909_v21 = vld [vmem:[#allocation2] sm:$0xff] }
  0xf3   : > { %1122 = vrot.lane.b32.xlu0 %v2909_v21, %s2554_s4  ;;  %1999 = vmatpush.xpose.msk.msra.mxu3 %vm965_vm1, %v2909_v21  ;;  %912 = vst.msk [vmem:[#allocation3] sm:$0xff] %vm855_vm0, %v910_v34 }
  0xf4   : > { %v943_v18 = vpop.f32.mrf.mxu2 }
  0xf5   : > { %v944_v19 = vadd.f32 %v2159_v17, %v943_v18  ;;  %v958_v18 = vsub.s32 0, %v2927_v28 }
  0xf7   : > { %v2907_v20 = vmul.f32 0.35355338, %v944_v19  ;;  %1037 = vmatpush.msrb.mxu3 %v2952_v44  ;;  %v959_v19 = vsel %vm955_vm2, %v958_v18, %v2927_v28 }
  0xf9   : > { %2000 = vmatmul.msk.f32.vlgmr.msra.gmra.mxu3 %vm965_vm1, %v2907_v20 }
  0xfa   : > { %v2937_v35 = vld [vmem:[#allocation3] sm:$0xff] }
  0xfb   : > { %1119 = vrot.lane.b32.xlu0 %v2907_v20, %s2554_s4  ;;  %1107 = vmatpush.msra.mxu0 %v2937_v35 }
 0x165   : > { %v1123_v23 = vpop.permute.xlu0 %1122 }
 0x166   : > { %2003 = vmatpush.xpose.msk.msra.mxu1 %vm965_vm1, %v1123_v23 }
 0x16a   : > { %1356 = vmatpush.msrb.mxu1 %v2952_v44 }
 0x16d   : > { %v1120_v25 = vpop.permute.xlu0 %1119 }
 0x16e   : > { %2004 = vmatmul.msk.f32.vlgmr.msra.gmra.mxu1 %vm965_vm1, %v1120_v25 }
 0x17c   : > { %v2930_v29 = vpop.f32.mrf.mxu3 }
 0x17d   : > { %v992_v30 = vsel %vm955_vm2, %v2930_v29, -1e+32 }
 0x17e   : > { %v993_v31 = vsel %vm965_vm1, %v992_v30, -inf }
 0x17f   : > { %994 = vmax.xlane.f32.xlu1 %v993_v31 }
 0x1eb   : > { %v2940_v36 = vpop.f32.mrf.mxu1 }
 0x1ec   : > { %v1148_v37 = vsel %vm955_vm2, %v2940_v36, -1e+32 }
 0x1ed   : > { %v1149_v38 = vsel %vm965_vm1, %v1148_v37, -inf }
 0x1ee   : > { %1150 = vmax.xlane.f32.xlu1 %v1149_v38  ;;  %v1057_v38 = vstv %s1056_s11  ;;  %s3242_s11 = sld [smem:[#allocation44_spill]] }
 0x1f2   : > { %v995_v39 = vpop.xlane.xlu1 %994 }
 0x1f3   : > { %v996_v40 = vsub.f32 %v992_v30, %v995_v39 }
 0x1f5   : > { %v997_v41 = vmul.f32 1.442695, %v996_v40 }
 0x1f7   : > { %2168 = vpow2.f32 %v997_v41 }
 0x1fd   : > { %v2169_v42 = vpop.eup %2168 }
 0x1fe   : > { %v999_v43 = vsel %vm965_vm1, %v2169_v42, 0.0 }
 0x1ff   : > { %1000 = vadd.xlane.f32.xlu2 %v999_v43 }
 0x207   : > { %1285 = vrot.lane.b32.xlu1 %v2909_v21, %s2555_s2 }
 0x261   : > { %v1151_v45 = vpop.xlane.xlu1 %1150 }
 0x262   : > { %v1152_v46 = vsub.f32 %v1148_v37, %v1151_v45 }
 0x264   : > { %v1153_v47 = vmul.f32 1.442695, %v1152_v46 }
 0x266   : > { %2170 = vpow2.f32 %v1153_v47 }
 0x26c   : > { %v2171_v48 = vpop.eup %2170 }
 0x26d   : > { %v1155_v49 = vsel %vm965_vm1, %v2171_v48, 0.0 }
 0x26e   : > { %1156 = vadd.xlane.f32.xlu2 %v1155_v49 }
 0x272   : > { %v1001_v50 = vpop.xlane.xlu2 %1000 }
 0x273   : > { %2172 = vrcp.f32 %v1001_v50  ;;  %v1013_v55 = vand.u32 2147483648, %v1001_v50  ;;  %v1011_v57 = vand.u32 2147483647, %v1001_v50  ;;  %vm1007_vm4 = vweird.f32 %v1001_v50 }
 0x275   : > { %v1014_v59 = vor.u32 1.1754944e-38, %v1013_v55  ;;  %vm1012_vm6 = vcmp.eq.f32.partialorder %v1011_v57, 8.507059e+37 }
 0x279   : > { %v2173_v51 = vpop.eup %2172  ;;  %v1286_v54 = vpop.permute.xlu1 %1285 }
 0x27a   : > { %v1003_v52 = vmul.f32 %v2173_v51, %v1001_v50  ;;  %2008 = vmatpush.xpose.msk.msrb.mxu0 %vm965_vm1, %v1286_v54  ;;  %vm1008_vm3 = vweird.f32 %v2173_v51 }
 0x27b   : > { %vm1009_vm5 = vmor %vm1007_vm4, %vm1008_vm3 }
 0x27c   : > { %v1004_v53 = vsub.f32 1.0, %v1003_v52 }
 0x27e   : > { %v1005_v56 = vmul.f32 %v2173_v51, %v1004_v53 }
 0x280   : > { %v1006_v58 = vadd.f32 %v2173_v51, %v1005_v56 }
 0x282   : > { %v1010_v60 = vsel %vm1009_vm5, %v2173_v51, %v1006_v58 }
 0x283   : > { %v1015_v63 = vsel %vm1012_vm6, %v1014_v59, %v1010_v60  ;;  %v1213_v60 = vstv %s2006_s27  ;;  %s3248_s27 = sld [smem:[#allocation52_spill]] }
 0x284   : > { %v1017_v0 = vmul.f32 %v2169_v42, %v1015_v63 }
 0x286   : > { %v1018_v1 = vmul.f32 %v2961_v62, %v1017_v0  ;;  %1246 = vrot.lane.b32.xlu2 %v2937_v35, %s2554_s4  ;;  %s2022_s4 = sshll.u32 %s3246_s28, 3 }
 0x288   : > { %2001 = vmatmul.msk.f32.vlgmr.msrb.gmra.mxu3 %vm965_vm1, %v1018_v1 }
 0x28e   : > { %1448 = vrot.lane.b32.xlu2 %v2909_v21, %s2557_s30  ;;  %v2978_v21 = vcvt.s32.f32 %v959_v19 }
 0x296   : > { %1282 = vrot.lane.b32.xlu2 %v2907_v20, %s2555_s2 }
 0x2e1   : > { %v1157_v2 = vpop.xlane.xlu2 %1156 }
 0x2e2   : > { %2174 = vrcp.f32 %v1157_v2  ;;  %v1169_v7 = vand.u32 2147483648, %v1157_v2  ;;  %v1167_v10 = vand.u32 2147483647, %v1157_v2  ;;  %vm1163_vm8 = vweird.f32 %v1157_v2 }
 0x2e4   : > { %v1170_v12 = vor.u32 1.1754944e-38, %v1169_v7  ;;  %vm1168_vm10 = vcmp.eq.f32.partialorder %v1167_v10, 8.507059e+37 }
 0x2e8   : > { %v2175_v3 = vpop.eup %2174 }
 0x2e9   : > { %v1159_v4 = vmul.f32 %v2175_v3, %v1157_v2  ;;  %v1247_v5 = vpop.permute.xlu2 %1246  ;;  %vm1164_vm7 = vweird.f32 %v2175_v3 }
 0x2ea   : > { %1267 = vmatpush.msra.mxu3 %v1247_v5  ;;  %vm1165_vm9 = vmor %vm1163_vm8, %vm1164_vm7 }
 0x2eb   : > { %v1160_v6 = vsub.f32 1.0, %v1159_v4 }
 0x2ed   : > { %v1161_v8 = vmul.f32 %v2175_v3, %v1160_v6 }
 0x2ef   : > { %v1162_v11 = vadd.f32 %v2175_v3, %v1161_v8 }
 0x2f1   : > { %v1166_v13 = vsel %vm1165_vm9, %v2175_v3, %v1162_v11  ;;  %v1449_v14 = vpop.permute.xlu2 %1448 }
 0x2f2   : > { %2013 = vmatpush.xpose.msk.msrb.mxu3 %vm965_vm1, %v1449_v14  ;;  %v1171_v15 = vsel %vm1168_vm10, %v1170_v12, %v1166_v13  ;;  %vm961_vm10 = vcmp.eq.s32.totalorder %v2924_v26, 0  ;;  %v2161_v26 = vld [vmem:[%s3240_s15] ss:$0 sm:$0xff]  ;;  %s1794_s15 = sshll.u32 %s841_s14, 4  ;;  %s1795_s15 = int_to_ptr.vmem [resolvable:$true] %s1794_s15 }
 0x2f3   : > { %v1173_v16 = vmul.f32 %v2171_v48, %v1171_v15 }
 0x2f5   : > { %v1174_v17 = vmul.f32 %v2961_v62, %v1173_v16 }
 0x2f7   : > { %2005 = vmatmul.msk.f32.vlgmr.msrb.gmra.mxu2 %vm965_vm1, %v1174_v17 }
 0x2f9   : > { %v1283_v13 = vpop.permute.xlu2 %1282 }
 0x30b   : > { %v1039_v22 = vpop.f32.mrf.mxu3 }
 0x30c   : > { %v1042_v23 = vmul.f32 %v1039_v22, %v2978_v21 }
 0x30e   : > { %v1043_v24 = vmax.f32 %v1042_v23, 0.0 }
 0x310   : > { %2176 = vrsqrt.f32 %v1043_v24  ;;  %vm1051_vm11 = vcmp.eq.f32.partialorder %v1043_v24, inf  ;;  %v1054_v37 = vand.u32 2147483648, %v1043_v24  ;;  %vm1053_vm12 = vcmp.eq.f32.partialorder %v1043_v24, 0.0 }
 0x316   : > { %v2177_v25 = vpop.eup %2176 }
 0x317   : > { %v1045_v27 = vmul.f32 %v2177_v25, %v1043_v24 }
 0x319   : > { %v1046_v30 = vmul.f32 %v2177_v25, %v1045_v27 }
 0x31b   : > { %v1047_v31 = vmul.f32 0.5, %v1046_v30 }
 0x31d   : > { %v1048_v32 = vsub.f32 1.5, %v1047_v31 }
 0x31f   : > { %v1049_v33 = vmul.f32 %v2177_v25, %v1048_v32 }
 0x321   : > { %v1050_v34 = vmul.f32 %v1049_v33, %v1043_v24 }
 0x323   : > { %v1052_v39 = vsel %vm1051_vm11, %v1043_v24, %v1050_v34 }
 0x324   : > { %v1055_v40 = vsel %vm1053_vm12, %v1054_v37, %v1052_v39 }
 0x325   : > { %v1058_v41 = vmul.f32 %v1057_v38, %v1055_v40 }
 0x327   : > { %v1059_v42 = vmul.f32 1.442695, %v1058_v41 }
 0x329   : > { %2178 = vpow2.f32 %v1059_v42 }
 0x32f   : > { %v2179_v43 = vpop.eup %2178 }
 0x330   : > { %v1061_v45 = vmax.f32 %v2179_v43, 1e-05 }
 0x332   : > { %v1062_v46 = vmin.f32 %v1061_v45, 100000.0 }
 0x334   : > { %v1063_v47 = vmul.f32 %v1062_v46, %v2930_v29 }
 0x336   : > { %v1064_v48 = vsel %vm955_vm2, %v1063_v47, -1e+32 }
 0x337   : > { %v1065_v49 = vsel %vm965_vm1, %v1064_v48, -inf }
 0x338   : > { %1066 = vmax.xlane.f32.xlu0 %v1065_v49 }
 0x37a   : > { %v1195_v50 = vpop.f32.mrf.mxu2 }
 0x37b   : > { %v1198_v51 = vmul.f32 %v1195_v50, %v2978_v21 }
 0x37d   : > { %v1199_v52 = vmax.f32 %v1198_v51, 0.0 }
 0x37f   : > { %2180 = vrsqrt.f32 %v1199_v52  ;;  %vm1207_vm13 = vcmp.eq.f32.partialorder %v1199_v52, inf  ;;  %v1210_v29 = vand.u32 2147483648, %v1199_v52  ;;  %vm1209_vm14 = vcmp.eq.f32.partialorder %v1199_v52, 0.0 }
 0x385   : > { %v2181_v53 = vpop.eup %2180 }
 0x386   : > { %v1201_v54 = vmul.f32 %v2181_v53, %v1199_v52 }
 0x388   : > { %v1202_v55 = vmul.f32 %v2181_v53, %v1201_v54 }
 0x38a   : > { %v1203_v56 = vmul.f32 0.5, %v1202_v55 }
 0x38c   : > { %v1204_v57 = vsub.f32 1.5, %v1203_v56 }
 0x38e   : > { %v1205_v58 = vmul.f32 %v2181_v53, %v1204_v57 }
 0x390   : > { %v1206_v59 = vmul.f32 %v1205_v58, %v1199_v52 }
 0x392   : > { %v1208_v61 = vsel %vm1207_vm13, %v1199_v52, %v1206_v59 }
 0x393   : > { %v1211_v63 = vsel %vm1209_vm14, %v1210_v29, %v1208_v61 }
 0x394   : > { %v1214_v0 = vmul.f32 %v1213_v60, %v1211_v63 }
 0x396   : > { %v1215_v1 = vmul.f32 1.442695, %v1214_v0 }
 0x398   : > { %2182 = vpow2.f32 %v1215_v1 }
 0x39e   : > { %v2183_v2 = vpop.eup %2182 }
 0x39f   : > { %v1217_v3 = vmax.f32 %v2183_v2, 1e-05 }
 0x3a1   : > { %v1218_v4 = vmin.f32 %v1217_v3, 100000.0 }
 0x3a3   : > { %v1219_v5 = vmul.f32 %v1218_v4, %v2940_v36 }
 0x3a5   : > { %v1220_v6 = vsel %vm955_vm2, %v1219_v5, -1e+32 }
 0x3a6   : > { %v1221_v7 = vsel %vm965_vm1, %v1220_v6, -inf }
 0x3a7   : > { %1222 = vmax.xlane.f32.xlu1 %v1221_v7 }
 0x3ab   : > { %v1067_v8 = vpop.xlane.xlu0 %1066 }
 0x3ac   : > { %v1068_v10 = vsub.f32 %v1064_v48, %v1067_v8 }
 0x3ae   : > { %v1069_v11 = vmul.f32 1.442695, %v1068_v10 }
 0x3b0   : > { %2184 = vpow2.f32 %v1069_v11 }
 0x3b6   : > { %v2990_v12 = vpop.eup %2184 }
 0x3b7   : > { %2002 = vmatmul.msk.f32.vlgmr.msra.gmra.mxu0 %vm965_vm1, %v2990_v12 }
 0x3b8   : > { %1519 = vmatpush.msra.mxu0 %v2952_v44 }
 0x3bf   : > { %2009 = vmatmul.msk.f32.vlgmr.msrb.gmra.mxu0 %vm965_vm1, %v1283_v13 }
 0x3c0   : > { %1445 = vrot.lane.b32.xlu1 %v2907_v20, %s2557_s30 }
 0x41a   : > { %v1223_v36 = vpop.xlane.xlu1 %1222 }
 0x41b   : > { %v1224_v14 = vsub.f32 %v1220_v6, %v1223_v36 }
 0x41d   : > { %v1225_v15 = vmul.f32 1.442695, %v1224_v14 }
 0x41f   : > { %2186 = vpow2.f32 %v1225_v15 }
 0x425   : > { %v2187_v16 = vpop.eup %2186 }
 0x426   : > { %2007 = vmatmul.msk.f32.vlgmr.msra.gmra.mxu3 %vm965_vm1, %v2187_v16  ;;  %v1227_v37 = vsel %vm965_vm1, %v2187_v16, 0.0 }
 0x432   : > { %v1446_v18 = vpop.permute.xlu1 %1445 }
 0x433   : > { %2014 = vmatmul.msk.f32.vlgmr.msrb.gmra.mxu3 %vm965_vm1, %v1446_v18 }
 0x434   : > { %v2999_v17 = vpop.f32.mrf.mxu0 }
 0x43c   : > { %v3002_v19 = vpop.f32.mrf.mxu0 }
 0x43d   : > { %v1311_v44 = vsel %vm955_vm2, %v3002_v19, -1e+32 }
 0x43e   : > { %v1312_v20 = vsel %vm965_vm1, %v1311_v44, -inf }
 0x43f   : > { %1313 = vmax.xlane.f32.xlu2 %v1312_v20 }
 0x457   : > { %1572 = vrot.lane.b32.xlu2 %v2937_v35, %s2557_s30 }
 0x4a9   : > { %v1269_v22 = vpop.f32.mrf.mxu3 }
 0x4b2   : > { %v1314_v23 = vpop.xlane.xlu2 %1313 }
 0x4b3   : > { %v1315_v24 = vsub.f32 %v1311_v44, %v1314_v23 }
 0x4b5   : > { %v1316_v25 = vmul.f32 1.442695, %v1315_v24 }
 0x4b6   : > { %v3010_v27 = vpop.f32.mrf.mxu3 }
 0x4b7   : > { %2188 = vpow2.f32 %v1316_v25  ;;  %v1474_v31 = vsel %vm955_vm2, %v3010_v27, -1e+32 }
 0x4b8   : > { %v1475_v32 = vsel %vm965_vm1, %v1474_v31, -inf }
 0x4b9   : > { %1476 = vmax.xlane.f32.xlu1 %v1475_v32 }
 0x4ba   : > { %v1573_v30 = vpop.permute.xlu2 %1572 }
 0x4bb   : > { %1593 = vmatpush.msra.mxu1 %v1573_v30 }
 0x4bd   : > { %v2189_v33 = vpop.eup %2188 }
 0x4be   : > { %v1318_v34 = vsel %vm965_vm1, %v2189_v33, 0.0 }
 0x4bf   : > { %1319 = vadd.xlane.f32.xlu0 %v1318_v34 }
 0x4c1   : > { %1228 = vadd.xlane.f32.xlu1 %v1227_v37 }
 0x52c   : > { %v1477_v38 = vpop.xlane.xlu1 %1476 }
 0x52d   : > { %v1478_v39 = vsub.f32 %v1474_v31, %v1477_v38 }
 0x52f   : > { %v1479_v40 = vmul.f32 1.442695, %v1478_v39  ;;  %v1376_v39 = vstv %s2011_s22  ;;  %s3243_s22 = sld [smem:[#allocation45_spill]] }
 0x532   : > { %v1320_v41 = vpop.xlane.xlu0 %1319 }
 0x533   : > { %2190 = vrcp.f32 %v1320_v41  ;;  %v1332_v49 = vand.u32 2147483648, %v1320_v41  ;;  %v1330_v52 = vand.u32 2147483647, %v1320_v41  ;;  %vm1326_vm3 = vweird.f32 %v1320_v41 }
 0x534   : > { %2192 = vpow2.f32 %v1479_v40  ;;  %v1229_v42 = vpop.xlane.xlu1 %1228 }
 0x535   : > { %2194 = vrcp.f32 %v1229_v42  ;;  %v1333_v55 = vor.u32 1.1754944e-38, %v1332_v49  ;;  %vm1331_vm5 = vcmp.eq.f32.partialorder %v1330_v52, 8.507059e+37  ;;  %v1241_v58 = vand.u32 2147483648, %v1229_v42 }
 0x536   : > { %v1239_v60 = vand.u32 2147483647, %v1229_v42  ;;  %vm1235_vm7 = vweird.f32 %v1229_v42 }
 0x537   : > { %v1242_v0 = vor.u32 1.1754944e-38, %v1241_v58 }
 0x538   : > { %vm1240_vm9 = vcmp.eq.f32.partialorder %v1239_v60, 8.507059e+37 }
 0x539   : > { %v2191_v43 = vpop.eup %2190 }
 0x53a   : > { %v2193_v45 = vpop.eup %2192  ;;  %v1322_v46 = vmul.f32 %v2191_v43, %v1320_v41  ;;  %vm1327_vm15 = vweird.f32 %v2191_v43 }
 0x53b   : > { %v1481_v47 = vsel %vm965_vm1, %v2193_v45, 0.0  ;;  %v2195_v50 = vpop.eup %2194  ;;  %vm1328_vm4 = vmor %vm1326_vm3, %vm1327_vm15 }
 0x53c   : > { %v1323_v48 = vsub.f32 1.0, %v1322_v46  ;;  %1482 = vadd.xlane.f32.xlu0 %v1481_v47  ;;  %v1231_v53 = vmul.f32 %v2195_v50, %v1229_v42  ;;  %vm1236_vm6 = vweird.f32 %v2195_v50 }
 0x53d   : > { %vm1237_vm8 = vmor %vm1235_vm7, %vm1236_vm6 }
 0x53e   : > { %v1324_v51 = vmul.f32 %v2191_v43, %v1323_v48  ;;  %v1232_v56 = vsub.f32 1.0, %v1231_v53 }
 0x540   : > { %v1325_v54 = vadd.f32 %v2191_v43, %v1324_v51  ;;  %v1233_v29 = vmul.f32 %v2195_v50, %v1232_v56 }
 0x542   : > { %v1329_v57 = vsel %vm1328_vm4, %v2191_v43, %v1325_v54  ;;  %v1234_v63 = vadd.f32 %v2195_v50, %v1233_v29  ;;  %v1539_v29 = vstv %s2016_s21 }
 0x543   : > { %v1334_v59 = vsel %vm1331_vm5, %v1333_v55, %v1329_v57 }
 0x544   : > { %v1336_v61 = vmul.f32 %v2189_v33, %v1334_v59  ;;  %v1238_v2 = vsel %vm1237_vm8, %v2195_v50, %v1234_v63 }
 0x545   : > { %v1243_v3 = vsel %vm1240_vm9, %v1242_v0, %v1238_v2  ;;  %vm1278_vm9 = vcmask 130112  }
 0x546   : > { %v1337_v1 = vmul.f32 %v2961_v62, %v1336_v61  ;;  %v1272_v4 = vmul.f32 %v1269_v22, %v1243_v3 }
 0x548   : > { %2010 = vmatmul.msk.f32.vlgmr.msrb.gmra.mxu1 %vm965_vm1, %v1337_v1  ;;  %v1273_v5 = vsel %vm961_vm10, 0.0, %v1272_v4 }
 0x549   : > { %1275 = vrot.lane.b32.xlu2 %v1273_v5, %s2558_s18  ;;  %s3249_s18 = smov %s3248_s27 }
 0x54a   : > { %s2467_s13 = scalar_lea.hbm %s3249_s18, 16 }
 0x5af   : > { %v1483_v6 = vpop.xlane.xlu0 %1482 }
 0x5b0   : > { %2196 = vrcp.f32 %v1483_v6  ;;  %v1495_v11 = vand.u32 2147483648, %v1483_v6  ;;  %v1493_v36 = vand.u32 2147483647, %v1483_v6  ;;  %vm1489_vm12 = vweird.f32 %v1483_v6 }
 0x5b2   : > { %v1496_v15 = vor.u32 1.1754944e-38, %v1495_v11  ;;  %vm1494_vm14 = vcmp.eq.f32.partialorder %v1493_v36, 8.507059e+37 }
 0x5b6   : > { %v2197_v7 = vpop.eup %2196 }
 0x5b7   : > { %v1485_v8 = vmul.f32 %v2197_v7, %v1483_v6  ;;  %vm1490_vm11 = vweird.f32 %v2197_v7 }
 0x5b8   : > { %vm1491_vm13 = vmor %vm1489_vm12, %vm1490_vm11 }
 0x5b9   : > { %v1486_v10 = vsub.f32 1.0, %v1485_v8 }
 0x5bb   : > { %v1487_v13 = vmul.f32 %v2197_v7, %v1486_v10 }
 0x5bd   : > { %v1488_v14 = vadd.f32 %v2197_v7, %v1487_v13  ;;  %v1071_v13 = vsel %vm965_vm1, %v2990_v12, 0.0 }
 0x5bf   : > { %v1492_v16 = vsel %vm1491_vm13, %v2197_v7, %v1488_v14 }
 0x5c0   : > { %v1497_v18 = vsel %vm1494_vm14, %v1496_v15, %v1492_v16 }
 0x5c1   : > { %v1499_v44 = vmul.f32 %v2193_v45, %v1497_v18 }
 0x5c3   : > { %v1500_v20 = vmul.f32 %v2961_v62, %v1499_v44 }
 0x5c5   : > { %v1358_v22 = vpop.f32.mrf.mxu1  ;;  %2015 = vmatmul.msk.f32.vlgmr.msra.gmra.mxu0 %vm965_vm1, %v1500_v20 }
 0x5c6   : > { %v1361_v23 = vmul.f32 %v1358_v22, %v2978_v21 }
 0x5c8   : > { %v1362_v24 = vmax.f32 %v1361_v23, 0.0 }
 0x5ca   : > { %2198 = vrsqrt.f32 %v1362_v24  ;;  %vm1370_vm15 = vcmp.eq.f32.partialorder %v1362_v24, inf  ;;  %v1373_v38 = vand.u32 2147483648, %v1362_v24  ;;  %vm1372_vm3 = vcmp.eq.f32.partialorder %v1362_v24, 0.0 }
 0x5d0   : > { %v2199_v25 = vpop.eup %2198 }
 0x5d1   : > { %v1364_v30 = vmul.f32 %v2199_v25, %v1362_v24 }
 0x5d3   : > { %v1365_v31 = vmul.f32 %v2199_v25, %v1364_v30 }
 0x5d5   : > { %v1366_v32 = vmul.f32 0.5, %v1365_v31 }
 0x5d7   : > { %v1367_v33 = vsub.f32 1.5, %v1366_v32 }
 0x5d9   : > { %v1368_v34 = vmul.f32 %v2199_v25, %v1367_v33 }
 0x5db   : > { %v1369_v37 = vmul.f32 %v1368_v34, %v1362_v24 }
 0x5dd   : > { %v1371_v40 = vsel %vm1370_vm15, %v1362_v24, %v1369_v37  ;;  %v1276_v37 = vpop.permute.xlu2 %1275 }
 0x5de   : > { %v1374_v62 = vsel %vm1372_vm3, %v1373_v38, %v1371_v40 }
 0x5df   : > { %v1377_v41 = vmul.f32 %v1376_v39, %v1374_v62 }
 0x5e1   : > { %v1378_v42 = vmul.f32 1.442695, %v1377_v41 }
 0x5e3   : > { %2200 = vpow2.f32 %v1378_v42 }
 0x5e9   : > { %v2201_v43 = vpop.eup %2200 }
 0x5ea   : > { %v1380_v45 = vmax.f32 %v2201_v43, 1e-05 }
 0x5ec   : > { %v1381_v46 = vmin.f32 %v1380_v45, 100000.0 }
 0x5ee   : > { %v1382_v47 = vmul.f32 %v1381_v46, %v3002_v19 }
 0x5f0   : > { %v1383_v48 = vsel %vm955_vm2, %v1382_v47, -1e+32 }
 0x5f1   : > { %v1384_v49 = vsel %vm965_vm1, %v1383_v48, -inf }
 0x5f2   : > { %1385 = vmax.xlane.f32.xlu0 %v1384_v49 }
 0x642   : > { %v1521_v50 = vpop.f32.mrf.mxu0 }
 0x643   : > { %v1524_v51 = vmul.f32 %v1521_v50, %v2978_v21 }
 0x645   : > { %v1525_v52 = vmax.f32 %v1524_v51, 0.0 }
 0x647   : > { %2202 = vrsqrt.f32 %v1525_v52  ;;  %vm1533_vm4 = vcmp.eq.f32.partialorder %v1525_v52, inf  ;;  %v1536_v19 = vand.u32 2147483648, %v1525_v52  ;;  %vm1535_vm5 = vcmp.eq.f32.partialorder %v1525_v52, 0.0 }
 0x64d   : > { %v2203_v53 = vpop.eup %2202 }
 0x64e   : > { %v1527_v54 = vmul.f32 %v2203_v53, %v1525_v52 }
 0x650   : > { %v1528_v55 = vmul.f32 %v2203_v53, %v1527_v54 }
 0x652   : > { %v1529_v56 = vmul.f32 0.5, %v1528_v55 }
 0x654   : > { %v1530_v57 = vsub.f32 1.5, %v1529_v56 }
 0x656   : > { %v1531_v58 = vmul.f32 %v2203_v53, %v1530_v57 }
 0x658   : > { %v1532_v59 = vmul.f32 %v1531_v58, %v1525_v52 }
 0x65a   : > { %v1534_v60 = vsel %vm1533_vm4, %v1525_v52, %v1532_v59 }
 0x65b   : > { %v1537_v61 = vsel %vm1535_vm5, %v1536_v19, %v1534_v60  ;;  %vm1441_vm5 = vcmask 195712  }
 0x65c   : > { %v1540_v63 = vmul.f32 %v1539_v29, %v1537_v61 }
 0x65e   : > { %v1541_v0 = vmul.f32 1.442695, %v1540_v63  ;;  %v1610_v63 = vld [vmem:[#allocation16 + $0x18] sm:$0xff] }
 0x660   : > { %2204 = vpow2.f32 %v1541_v0  ;;  %v1609_v0 = vld [vmem:[#allocation16 + $0x10] sm:$0xff] }
 0x665   : > { %v1386_v21 = vpop.xlane.xlu0 %1385 }
 0x666   : > { %v2205_v1 = vpop.eup %2204  ;;  %v1387_v2 = vsub.f32 %v1383_v48, %v1386_v21  ;;  %v1608_v21 = vld [vmem:[#allocation16 + $0x8] sm:$0xff] }
 0x667   : > { %v1543_v3 = vmax.f32 %v2205_v1, 1e-05  ;;  %v1607_v1 = vld [vmem:[#allocation16] sm:$0xff] }
 0x668   : > { %v1388_v4 = vmul.f32 1.442695, %v1387_v2 }
 0x669   : > { %v1544_v5 = vmin.f32 %v1543_v3, 100000.0 }
 0x66a   : > { %2206 = vpow2.f32 %v1388_v4 }
 0x66b   : > { %v1545_v6 = vmul.f32 %v1544_v5, %v3010_v27 }
 0x66d   : > { %v1546_v7 = vsel %vm955_vm2, %v1545_v6, -1e+32 }
 0x66e   : > { %v1547_v8 = vsel %vm965_vm1, %v1546_v7, -inf }
 0x66f   : > { %1548 = vmax.xlane.f32.xlu0 %v1547_v8 }
 0x670   : > { %v2207_v10 = vpop.eup %2206 }
 0x671   : > { %v1390_v11 = vsel %vm965_vm1, %v2207_v10, 0.0 }
 0x672   : > { %1391 = vadd.xlane.f32.xlu1 %v1390_v11 }
 0x67a   : > { %1072 = vadd.xlane.f32.xlu1 %v1071_v13 }
 0x683   : > { %1409 = vrot.lane.b32.xlu0 %v2937_v35, %s2555_s2 }
 0x6e2   : > { %v1549_v36 = vpop.xlane.xlu0 %1548 }
 0x6e3   : > { %v1550_v14 = vsub.f32 %v1546_v7, %v1549_v36 }
 0x6e5   : > { %v1551_v27 = vmul.f32 1.442695, %v1550_v14  ;;  %v3041_v15 = vpop.xlane.xlu1 %1391 }
 0x6e6   : > { %v1404_v54 = vand.u32 2147483648, %v3041_v15  ;;  %vm1398_vm15 = vweird.f32 %v3041_v15  ;;  %v1402_v56 = vand.u32 2147483647, %v3041_v15 }
 0x6e7   : > { %2208 = vpow2.f32 %v1551_v27 }
 0x6e8   : > { %v1405_v59 = vor.u32 1.1754944e-38, %v1404_v54  ;;  %vm1403_vm4 = vcmp.eq.f32.partialorder %v1402_v56, 8.507059e+37 }
 0x6ed   : > { %v2209_v28 = vpop.eup %2208  ;;  %v1073_v16 = vpop.xlane.xlu1 %1072 }
 0x6ee   : > { %2210 = vrcp.f32 %v1073_v16  ;;  %2017 = vmatmul.msk.f32.vlgmr.msra.gmra.mxu1 %vm965_vm1, %v2209_v28  ;;  %v1553_v18 = vsel %vm965_vm1, %v2209_v28, 0.0  ;;  %v1085_v35 = vand.u32 2147483648, %v1073_v16  ;;  %v1083_v24 = vand.u32 2147483647, %v1073_v16 }
 0x6ef   : > { %1554 = vadd.xlane.f32.xlu0 %v1553_v18  ;;  %vm1079_vm6 = vweird.f32 %v1073_v16  ;;  %2212 = vrcp.f32 %v3041_v15 }
 0x6f0   : > { %v1086_v30 = vor.u32 1.1754944e-38, %v1085_v35  ;;  %vm1084_vm8 = vcmp.eq.f32.partialorder %v1083_v24, 8.507059e+37  ;;  %v1678_v35 = vld [vmem:[#allocation18] sm:$0xff] }
 0x6f1   : > { %v1716_v24 = vld [vmem:[%s3241_s20 + $0x30] sm:$0xff] }
 0x6f4   : > { %v2211_v44 = vpop.eup %2210 }
 0x6f5   : > { %v1075_v12 = vmul.f32 %v2211_v44, %v1073_v16  ;;  %v1410_v20 = vpop.permute.xlu0 %1409  ;;  %vm1080_vm2 = vweird.f32 %v2211_v44  ;;  %v2213_v39 = vpop.eup %2212 }
 0x6f6   : > { %1430 = vmatpush.msra.mxu2 %v1410_v20  ;;  %vm1081_vm7 = vmor %vm1079_vm6, %vm1080_vm2  ;;  %v1394_v40 = vmul.f32 %v2213_v39, %v3041_v15  ;;  %vm1399_vm14 = vweird.f32 %v2213_v39  ;;  %vm1604_vm2 = vcmask 261312   ;;  %v1680_v20 = vld [vmem:[#allocation18 + $0x10] sm:$0xff] }
 0x6f7   : > { %v1076_v22 = vsub.f32 1.0, %v1075_v12  ;;  %2012 = vmatmul.msk.f32.vlgmr.msra.gmra.mxu2 %vm965_vm1, %v2207_v10  ;;  %vm1400_vm3 = vmor %vm1398_vm15, %vm1399_vm14  ;;  %v2561_v10 = vmov 32.0   ;;  %v1681_v12 = vld [vmem:[#allocation18 + $0x18] sm:$0xff] }
 0x6f8   : > { %v1395_v41 = vsub.f32 1.0, %v1394_v40  ;;  %1630 = vmatpush.msrb.mxu2 %v1610_v63  ;;  %1701 = vmatpush.msra.mxu3 %v1681_v12 }
 0x6f9   : > { %v1077_v23 = vmul.f32 %v2211_v44, %v1076_v22  ;;  %v1679_v22 = vld [vmem:[#allocation18 + $0x8] sm:$0xff] }
 0x6fa   : > { %v1396_v47 = vmul.f32 %v2213_v39, %v1395_v41  ;;  %1631 = vmatpush.msrb.mxu2 %v1609_v0  ;;  %1702 = vmatpush.msra.mxu3 %v1680_v20 }
 0x6fb   : > { %v1078_v25 = vadd.f32 %v2211_v44, %v1077_v23  ;;  %v1717_v23 = vld [vmem:[%s3241_s20 + $0x38] sm:$0xff] }
 0x6fc   : > { %v1397_v51 = vadd.f32 %v2213_v39, %v1396_v47  ;;  %1632 = vmatpush.msrb.mxu2 %v1608_v21  ;;  %1703 = vmatpush.msra.mxu3 %v1679_v22 }
 0x6fd   : > { %v1082_v31 = vsel %vm1081_vm7, %v2211_v44, %v1078_v25  ;;  %1734 = vmatpush.msrb.mxu0 %v1717_v23  ;;  %v1715_v25 = vld [vmem:[%s3241_s20 + $0x28] sm:$0xff] }
 0x6fe   : > { %v1087_v32 = vsel %vm1084_vm8, %v1086_v30, %v1082_v31  ;;  %v1401_v58 = vsel %vm1400_vm3, %v2213_v39, %v1397_v51  ;;  %1633 = vmatpush.msrb.mxu2 %v1607_v1  ;;  %1704 = vmatpush.msra.mxu3 %v1678_v35  ;;  %v2164_v51 = vld [vmem:[%s3244_s5] ss:$0 sm:$0xff] }
 0x6ff   : > { %v1112_v33 = vmul.f32 %v2999_v17, %v1087_v32  ;;  %v1406_v19 = vsel %vm1403_vm4, %v1405_v59, %v1401_v58  ;;  %1735 = vmatpush.msrb.mxu0 %v1716_v24  ;;  %v1714_v32 = vld [vmem:[%s3241_s20 + $0x20] sm:$0xff] }
 0x701   : > { %v1115_v34 = vsel %vm961_vm10, 0.0, %v1112_v33  ;;  %1736 = vmatpush.msrb.mxu0 %v1715_v25 }
 0x702   : > { %1116 = vst.msk [vmem:[#allocation4] sm:$0xff] %vm965_vm1, %v1115_v34  ;;  %v1713_v34 = vld [vmem:[%s3241_s20 + $0x18] sm:$0xff] }
 0x703   : > { %1279 = vst.msk [vmem:[#allocation4] sm:$0xff] %vm1278_vm9, %v1276_v37  ;;  %1737 = vmatpush.msrb.mxu0 %v1714_v32  ;;  %vm1722_vm9 = vcmask 523264  }
 0x705   : > { %1738 = vmatpush.msrb.mxu0 %v1713_v34 }
 0x762   : > { %v1555_v38 = vpop.xlane.xlu0 %1554 }
 0x763   : > { %2214 = vrcp.f32 %v1555_v38  ;;  %v1567_v17 = vand.u32 2147483648, %v1555_v38  ;;  %v1565_v46 = vand.u32 2147483647, %v1555_v38  ;;  %vm1561_vm12 = vweird.f32 %v1555_v38 }
 0x764   : > { %2216 = vrcp.f32 %v2561_v10 }
 0x765   : > { %v1568_v49 = vor.u32 1.1754944e-38, %v1567_v17  ;;  %vm1566_vm13 = vcmp.eq.f32.partialorder %v1565_v46, 8.507059e+37 }
 0x769   : > { %v2215_v62 = vpop.eup %2214 }
 0x76a   : > { %v1557_v42 = vmul.f32 %v2215_v62, %v1555_v38  ;;  %vm1562_vm11 = vweird.f32 %v2215_v62  ;;  %v2217_v11 = vpop.eup %2216 }
 0x76b   : > { %vm1563_vm1 = vmor %vm1561_vm12, %vm1562_vm11  ;;  %v1595_v53 = vpop.f32.mrf.mxu1  ;;  %v1643_v13 = vmul.f32 32.0, %v2217_v11 }
 0x76c   : > { %v1558_v43 = vsub.f32 1.0, %v1557_v42  ;;  %v2162_v42 = vld [vmem:[%s3242_s11] ss:$0 sm:$0xff] }
 0x76d   : > { %v1644_v36 = vsub.f32 1.0, %v1643_v13 }
 0x76e   : > { %v1559_v45 = vmul.f32 %v2215_v62, %v1558_v43 }
 0x76f   : > { %v1645_v14 = vmul.f32 %v2217_v11, %v1644_v36 }
 0x770   : > { %v1560_v48 = vadd.f32 %v2215_v62, %v1559_v45  ;;  %v2163_v45 = vld [vmem:[%s3243_s22] ss:$0 sm:$0xff]  ;;  %s1792_s22 = scalar_lea.hbm %s3248_s27, %s2022_s4 }
 0x771   : > { %v1646_v27 = vadd.f32 %v2217_v11, %v1645_v14  ;;  %s1796_s17 = sshll.u32 %s1792_s22, 4  ;;  %s1797_s17 = int_to_ptr.hbm [resolvable:$true] %s1796_s17 }
 0x772   : > { %v1564_v50 = vsel %vm1563_vm1, %v2215_v62, %v1560_v48  ;;  %v1712_v48 = vld [vmem:[%s3241_s20 + $0x10] sm:$0xff]  ;;  %s2461_s5 = sshra.s32 %s1797_s17, 4  ;;  %s2462_s5 = int_to_ptr.hbm [resolvable:$true] %s2461_s5 }
 0x773   : > { %v1569_v52 = vsel %vm1566_vm13, %v1568_v49, %v1564_v50  ;;  %1739 = vmatpush.msrb.mxu0 %v1712_v48  ;;  %v1711_v49 = vld [vmem:[%s3241_s20 + $0x8] sm:$0xff]  ;;  %v1710_v50 = vld [vmem:[%s3241_s20] sm:$0xff]  ;;  %s2463_s24 = scalar_lea.hbm %s2462_s5, 8  ;;  %p2468_p10 = scmp.lt.s32.totalorder %s2462_s5, %s3249_s18 }
 0x774   : > { %v1598_v55 = vmul.f32 %v1595_v53, %v1569_v52  ;;  %p2464_p1 = scmp.ne.s32.totalorder %s2462_s5, %s2463_s24  ;;  %p2469_p11 = scmp.lt.s32.totalorder %s2467_s13, %s2463_s24 }
 0x775   : > { %1740 = vmatpush.msrb.mxu0 %v1711_v49 }
 0x776   : > { %v1599_v57 = vsel %vm961_vm10, 0.0, %v1598_v55  ;;  %v2165_v55 = vld [vmem:[%s3245_s7] ss:$0 sm:$0xff]  ;;  %p2465_p3 = pnand %p2464_p1, %p2757_p2  ;;  %p2470_p12 = por %p2469_p11, %p2468_p10 }
 0x777   : > { %1601 = vrot.lane.b32.xlu2 %v1599_v57, %s2559_s0  ;;  %1741 = vmatpush.msrb.mxu0 %v1710_v50 }
 0x778   : > { %p2466_p6 = pneg %p2465_p3 }
 0x77a   : > { %v1432_v29 = vpop.f32.mrf.mxu2  ;;  %p2471_p13 = pnand %p2470_p12, %p2466_p6 }
 0x77b   : > { %v1435_v60 = vmul.f32 %v1432_v29, %v1406_v19 }
 0x77d   : > { %v1436_v61 = vsel %vm961_vm10, 0.0, %v1435_v60  ;;  %vm1647_vm10 = vweird.f32 %v2217_v11 }
 0x77e   : > { %1438 = vrot.lane.b32.xlu1 %v1436_v61, %s2560_s3  ;;  %v3065_v15 = vsel %vm1647_vm10, %v2217_v11, %v1646_v27  ;;  %v2167_v11 = vld [vmem:[%s3251_s16] ss:$0 sm:$0xff] }
 0x7d1   : > { %v1602_v3 = vpop.permute.xlu2 %1601 }
 0x7f0   : > { %v1439_v2 = vpop.permute.xlu1 %1438 }
 0x7f1   : > { %1442 = vst.msk [vmem:[#allocation4] sm:$0xff] %vm1441_vm5, %v1439_v2 }
 0x7f2   : > { %1605 = vst.msk [vmem:[#allocation4] sm:$0xff] %vm1604_vm2, %v1602_v3 }
 0x7f9   : > { %v1606_v4 = vld [vmem:[#allocation4] sm:$0xff] }
 0x7fa   : > { %2018 = vmatmul.msk.f32.vlgmr.msrb.gmra.mxu2 %vm855_vm0, %v1606_v4 }
 0x87d   : > { %v1635_v5 = vpop.f32.mrf.mxu2 }
 0x87e   : > { %v1636_v6 = vadd.f32 %v2161_v26, %v1635_v5 }
 0x880   : > { %v1638_v7 = vadd.f32 %v1636_v6, %v2886_v9 }
 0x882   : > { %v1639_v8 = vsel %vm855_vm0, %v1638_v7, 0.0 }
 0x883   : > { %1640 = vadd.xlane.f32.xlu2 %v1639_v8 }
 0x8f6   : > { %v1641_v28 = vpop.xlane.xlu2 %1640 }
 0x8f7   : > { %v1649_v16 = vmul.f32 %v3065_v15, %v1641_v28 }
 0x8f9   : > { %v1650_v18 = vsub.f32 %v1638_v7, %v1649_v16  ;;  %v2166_v7 = vld [vmem:[%s3247_s29] ss:$0 sm:$0xff] }
 0x8fb   : > { %v1651_v44 = vmul.f32 %v1650_v18, %v1650_v18 }
 0x8fd   : > { %v1652_v9 = vsel %vm855_vm0, %v1651_v44, 0.0 }
 0x8fe   : > { %1653 = vadd.xlane.f32.xlu1 %v1652_v9 }
 0x971   : > { %v1654_v30 = vpop.xlane.xlu1 %1653 }
 0x972   : > { %v1655_v31 = vmul.f32 %v1654_v30, %v3065_v15 }
 0x974   : > { %v1656_v33 = vadd.f32 1e-05, %v1655_v31 }
 0x976   : > { %2218 = vrsqrt.f32 %v1656_v33  ;;  %vm1663_vm7 = vweird.f32 %v1656_v33 }
 0x97c   : > { %v2219_v37 = vpop.eup %2218 }
 0x97d   : > { %v1658_v38 = vmul.f32 %v2219_v37, %v1656_v33  ;;  %vm1664_vm6 = vweird.f32 %v2219_v37 }
 0x97e   : > { %vm1665_vm8 = vmor %vm1663_vm7, %vm1664_vm6 }
 0x97f   : > { %v1659_v39 = vmul.f32 %v2219_v37, %v1658_v38 }
 0x981   : > { %v1660_v40 = vmul.f32 0.5, %v1659_v39 }
 0x983   : > { %v1661_v62 = vsub.f32 1.5, %v1660_v40 }
 0x985   : > { %v1662_v41 = vmul.f32 %v2219_v37, %v1661_v62 }
 0x987   : > { %v1666_v43 = vsel %vm1665_vm8, %v2219_v37, %v1662_v41 }
 0x988   : > { %v1667_v17 = vmul.f32 %v1666_v43, %v1650_v18 }
 0x98a   : > { %v1672_v46 = vmul.f32 %v2162_v42, %v1667_v17 }
 0x98c   : > { %v1677_v47 = vadd.f32 %v2163_v45, %v1672_v46 }
 0x98e   : > { %2019 = vmatmul.msk.f32.vlgmr.msra.gmra.mxu3 %vm855_vm0, %v1677_v47 }
 0xa11   : > { %v1706_v52 = vpop.f32.mrf.mxu3 }
 0xa12   : > { %v1707_v53 = vadd.f32 %v2164_v51, %v1706_v52 }
 0xa14   : > { %v1709_v54 = vmax.f32 %v1707_v53, 0.0 }
 0xa16   : > { %2020 = vmatmul.msk.f32.vlgmr.msrb.gmra.mxu0 %vm1722_vm9, %v1709_v54 }
 0xa93   : > { %v1743_v56 = vpop.f32.mrf.mxu0 }
 0xa94   : > { %v1744_v57 = vadd.f32 %v2165_v55, %v1743_v56 }
 0xa96   : > { %v1746_v58 = vadd.f32 %v1744_v57, %v1677_v47 }
 0xa98   : > { %v1747_v59 = vsel %vm855_vm0, %v1746_v58, 0.0 }
 0xa99   : > { %1748 = vadd.xlane.f32.xlu0 %v1747_v59 }
 0xb0c   : > { %v1749_v19 = vpop.xlane.xlu0 %1748 }
 0xb0d   : > { %v1750_v29 = vmul.f32 %v1749_v19, %v3065_v15 }
 0xb0f   : > { %v1751_v60 = vsub.f32 %v1746_v58, %v1750_v29 }
 0xb11   : > { %v1752_v61 = vmul.f32 %v1751_v60, %v1751_v60 }
 0xb13   : > { %v1753_v63 = vsel %vm855_vm0, %v1752_v61, 0.0 }
 0xb14   : > { %1754 = vadd.xlane.f32.xlu0 %v1753_v63 }
 0xb87   : > { %v1755_v0 = vpop.xlane.xlu0 %1754 }
 0xb88   : > { %v1756_v21 = vmul.f32 %v1755_v0, %v3065_v15 }
 0xb8a   : > { %v1757_v1 = vadd.f32 1e-05, %v1756_v21 }
 0xb8c   : > { %2220 = vrsqrt.f32 %v1757_v1  ;;  %vm1764_vm12 = vweird.f32 %v1757_v1 }
 0xb92   : > { %v2221_v2 = vpop.eup %2220 }
 0xb93   : > { %v1759_v3 = vmul.f32 %v2221_v2, %v1757_v1  ;;  %vm1765_vm11 = vweird.f32 %v2221_v2 }
 0xb94   : > { %vm1766_vm1 = vmor %vm1764_vm12, %vm1765_vm11 }
 0xb95   : > { %v1760_v4 = vmul.f32 %v2221_v2, %v1759_v3 }
 0xb97   : > { %v1761_v26 = vmul.f32 0.5, %v1760_v4 }
 0xb99   : > { %v1762_v5 = vsub.f32 1.5, %v1761_v26 }
 0xb9b   : > { %v1763_v6 = vmul.f32 %v2221_v2, %v1762_v5 }
 0xb9d   : > { %v1767_v8 = vsel %vm1766_vm1, %v2221_v2, %v1763_v6 }
 0xb9e   : > { %v1768_v10 = vmul.f32 %v1767_v8, %v1751_v60 }
 0xba0   : > { %v1773_v13 = vmul.f32 %v2166_v7, %v1768_v10 }
 0xba2   : > { %v1778_v36 = vadd.f32 %v2167_v11, %v1773_v13 }
 0xba4   : > { %1779 = vst.msk [vmem:[%s841_s14] sm:$0xff] %vm855_vm0, %v1778_v36 }
 0xba5   : > { %2474 = shalt.err (!%p2471_p13)
}
 0xba6   : > { %2051 = dma.vmem_to_hbm [thread:$0]  (%p2757_p2), %s1795_s15, 128, %s1797_s17, %s1781_s12  }
 0xba7 PF: > { %s3252_s9 = sld [smem:[#allocation26_spill]]  ;;  %p2080_p0 = pnand %p1978_p4, %p2764_p7 }
 0xba8   : > { %s3254_s19 = sld [smem:[#allocation29_spill]] }
 0xba9   : > { %p2081_p5 = pneg %p2080_p0 }
 0xbad   : > { %s1808_s29 = sand.u32 1, %s3252_s9  }
 0xbae   : > { %s1809_s30 = scalar_lea.sflag [#allocation7], %s1808_s29 }
 0xbaf   : > { %2520 = dma.done.wait (%p2081_p5), %s1809_s30, 128  }
 0xbb0   : > { %2522 = vsyncadd (%p2081_p5), %s1809_s30, 4294967168  ;;  %s43_s28 = sadd.s32 1, %s3254_s19   ;;  %s3255_s11 = sld [smem:[#allocation32_spill]] }
 0xbb1   : > { %p40_p9 = scmp.ge.s32.totalorder %s43_s28, 4   ;;  %s3256_s27 = sld [smem:[#allocation28_spill]] }
 0xbb2   : > { %s3257_s3 = sld [smem:[#allocation30_spill]]  ;;  %s3258_s2 = smov %s2529_s25 }
 0xbb3   : > { %s3259_s25 = smov %s2533_s26  ;;  %42 = sbr.rel (!%p40_p9) target bundleno = 31 (0x1f), region = 198 }
 0xbb6   : > { %s3260_s26 = smov %s3255_s11 }
 0xbb8   :  { %1815 = vsyncpa [#allocation6], 1 }
 0xbb9   :  { %1817 = vsyncpa [#allocation6 + $0x1], 1 }
 0xbba   :  { %1818 = vsyncpa [#allocation11], 1 }
 0xbbb   :  { %1820 = vsyncpa [#allocation11 + $0x1], 1 }
 0xbbc   :  { %1821 = vsyncpa [#allocation14], 1 }
 0xbbd   :  { %1822 = vsyncpa [#allocation17], 1 }
 0xbbe   :  { %1823 = vsyncpa [#allocation7], 1 }
 0xbbf   :  { %1825 = vsyncpa [#allocation7 + $0x1], 1 }
 0xbc0   :  { %1826 = vsyncpa [#allocation8], 1 }
 0xbc1   :  { %1828 = vsyncpa [#allocation8 + $0x1], 1 }

</bundles_post_ra>
